<compile_context>
chip_gen: v7x
topology: tpu7x:2x2x1
jax: 0.10.0
libtpu: 0.0.40
codegen_flags: <defaults>
</compile_context>

<pallas_src>
import functools

import jax
import jax.numpy as jnp
from jax.experimental import pallas as pl
from jax.experimental.pallas import tpu as pltpu

F32 = jnp.float32
BF16 = jnp.bfloat16

# ---------------- model dimensions ----------------
FEAT_DIM = 25            # per-point feature dim (as in the original module)
POS_DIM = 3
NET_IN = FEAT_DIM + POS_DIM     # 28
HIDDEN = 32
N_BINS = 10              # contact / weight bins (original: ...view(B, V, 10))
HEAD_DIM = 2 * N_BINS    # fused contact||weight head
DIS_HIDDEN = 32
DIS_OUT = 32

MAX_ROW_TILE = 2048
TARGET_GRID_STEPS = 4    # keep >=2 grid steps so v7x megacore can shard rows


def _choose_row_tile(n):
    """~N/TARGET_GRID_STEPS rows per step, multiple of 8, capped at 2048."""
    tile = -(-n // TARGET_GRID_STEPS)          # ceil
    tile = ((tile + 7) // 8) * 8               # sublane-align
    return max(8, min(MAX_ROW_TILE, tile))


# ====================== Pallas kernels ======================

def _pointnet_kernel(x_ref, pos_ref, w1x_ref, w1p_ref, b1_ref,
                     w2_ref, b2_ref, w34_ref, b34_ref, o_ref):
    """Fused per-point MLP.

    First layer = feats@W1[:25] + pos@W1[25:] (avoids a pre-kernel concat).
    Heads fused: one (HIDDEN, 20) matmul; sigmoid applied to the last 10 lanes
    via a lane mask so there is a single output store stream.
    Matmuls are bf16 on the MXU with f32 accumulation.
    """
    h1 = jnp.dot(x_ref[...].astype(BF16), w1x_ref[...],
                 preferred_element_type=jnp.float32)
    h1 = h1 + jnp.dot(pos_ref[...].astype(BF16), w1p_ref[...],
                      preferred_element_type=jnp.float32)
    h1 = jnp.maximum(h1 + b1_ref[...], 0.0)
    h2 = jnp.maximum(
        jnp.dot(h1.astype(BF16), w2_ref[...],
                preferred_element_type=jnp.float32) + b2_ref[...], 0.0)
    y = jnp.dot(h2.astype(BF16), w34_ref[...],
                preferred_element_type=jnp.float32) + b34_ref[...]
    cols = jax.lax.broadcasted_iota(jnp.int32, y.shape, 1)
    o_ref[...] = jnp.where(cols < N_BINS, y, jax.nn.sigmoid(y))


def pointnet_forward(x, pos, p):
    """x: (N, 25) feats, pos: (N, 3) -> (contact (N, 10), weight (N, 10))."""
    n = x.shape[0]
    tile = _choose_row_tile(n)
    n_pad = -(-n // tile) * tile
    if n_pad != n:
        x = jnp.pad(x, ((0, n_pad - n), (0, 0)))
        pos = jnp.pad(pos, ((0, n_pad - n), (0, 0)))

    # bf16 weights for the MXU; biases stay f32 (added after f32 accumulation).
    w1 = p["w1"].astype(BF16)
    w1x, w1p = w1[:FEAT_DIM], w1[FEAT_DIM:]
    w2 = p["w2"].astype(BF16)
    w34 = jnp.concatenate([p["w3"], p["w4"]], axis=1).astype(BF16)   # (H, 20)
    b34 = jnp.concatenate([p["b3"], p["b4"]], axis=1)                # (1, 20)

    grid = (n_pad // tile,)
    row = lambda i: (i, 0)
    full = lambda i: (0, 0)

    y = pl.pallas_call(
        _pointnet_kernel,
        out_shape=jax.ShapeDtypeStruct((n_pad, HEAD_DIM), F32),
        grid=grid,
        in_specs=[
            pl.BlockSpec((tile, FEAT_DIM), row),
            pl.BlockSpec((tile, POS_DIM), row),
            pl.BlockSpec((FEAT_DIM, HIDDEN), full),
            pl.BlockSpec((POS_DIM, HIDDEN), full),
            pl.BlockSpec((1, HIDDEN), full),
            pl.BlockSpec((HIDDEN, HIDDEN), full),
            pl.BlockSpec((1, HIDDEN), full),
            pl.BlockSpec((HIDDEN, HEAD_DIM), full),
            pl.BlockSpec((1, HEAD_DIM), full),
        ],
        out_specs=pl.BlockSpec((tile, HEAD_DIM), row),
        compiler_params=pltpu.CompilerParams(
            dimension_semantics=("parallel",)),
    )(x, pos, w1x, w1p, p["b1"], w2, p["b2"], w34, b34)

    y = y[:n]
    return y[:, :N_BINS], y[:, N_BINS:]


def _disnet_kernel(b, v, c_ref, w1_ref, b1_ref, w2_ref, b2_ref, o_ref):
    """Discriminator feature: per-point MLP -> per-batch mean -> linear.

    The per-batch mean over points is a block-diagonal (B, B*V) pooling-matrix
    matmul on the MXU (keeps the XLU slot free). Single grid step handles all
    batches, so there is exactly one pallas_call launch per DisNet.
    """
    h = jnp.maximum(
        jnp.dot(c_ref[...].astype(BF16), w1_ref[...],
                preferred_element_type=jnp.float32) + b1_ref[...], 0.0)
    rows = jax.lax.broadcasted_iota(jnp.int32, (b, b * v), 0)
    cols = jax.lax.broadcasted_iota(jnp.int32, (b, b * v), 1)
    in_batch = (cols >= rows * v) & (cols < (rows + 1) * v)
    pool = jnp.where(in_batch, 1.0 / v, 0.0).astype(BF16)            # (B, B*V)
    g = jnp.dot(pool, h.astype(BF16), preferred_element_type=jnp.float32)
    o_ref[...] = (jnp.dot(g.astype(BF16), w2_ref[...],
                          preferred_element_type=jnp.float32) + b2_ref[...])


def disnet_forward(contact, p):
    """contact: (B, V, N_BINS) -> (B, DIS_OUT)."""
    b, v, c = contact.shape
    assert c == N_BINS
    flat = contact.reshape(b * v, N_BINS)
    w1 = p["w1"].astype(BF16)
    w2 = p["w2"].astype(BF16)
    full = lambda i: (0, 0)
    return pl.pallas_call(
        functools.partial(_disnet_kernel, b, v),
        out_shape=jax.ShapeDtypeStruct((b, DIS_OUT), F32),
        grid=(1,),
        in_specs=[
            pl.BlockSpec((b * v, N_BINS), full),
            pl.BlockSpec((N_BINS, DIS_HIDDEN), full),
            pl.BlockSpec((1, DIS_HIDDEN), full),
            pl.BlockSpec((DIS_HIDDEN, DIS_OUT), full),
            pl.BlockSpec((1, DIS_OUT), full),
        ],
        out_specs=pl.BlockSpec((b, DIS_OUT), full),
    )(flat, w1, p["b1"], w2, p["b2"])


# ====================== plain-JAX glue (matches CREN static methods) ======================

def _normalize(v, eps=1e-12):
    n = jnp.linalg.norm(v, axis=-1, keepdims=True)
    return v / jnp.maximum(n, eps)


def get_normalizing_tform(hand_verts, obj_verts, key):
    obj_centroid = jnp.mean(obj_verts, axis=1)              # (B, 3)
    hand_centroid = jnp.mean(hand_verts, axis=1)             # (B, 3)
    x_vec = _normalize(hand_centroid - obj_centroid)
    # random_rot=True path: first column of a random rotation == random unit vector
    rand_col = _normalize(jax.random.normal(key, hand_centroid.shape, F32))
    y_vec = _normalize(jnp.cross(x_vec, rand_col))
    z_vec = _normalize(jnp.cross(x_vec, y_vec))
    b = hand_verts.shape[0]
    tform = jnp.tile(jnp.eye(4, dtype=F32)[None], (b, 1, 1))
    tform = tform.at[:, :3, 0].set(x_vec)
    tform = tform.at[:, :3, 1].set(y_vec)
    tform = tform.at[:, :3, 2].set(z_vec)
    tform = tform.at[:, :3, 3].set(obj_centroid)
    return jnp.linalg.inv(tform)


def apply_tform(tform, verts):
    ones = jnp.ones(verts.shape[:-1] + (1,), verts.dtype)
    verts_h = jnp.concatenate([verts, ones], axis=-1)         # (B, V, 4)
    out = jnp.einsum("bij,bnj->bni", tform, verts_h)
    return out[..., :3]


def verts_to_pointcloud(hand_verts, hand_feats, obj_verts, obj_feats):
    batch_size = hand_verts.shape[0]
    ptcloud_pos = jnp.concatenate((hand_verts, obj_verts), axis=1)
    ptcloud_x = jnp.concatenate((hand_feats, obj_feats), axis=1)
    _, n, _ = ptcloud_pos.shape
    pos = ptcloud_pos.reshape(batch_size * n, -1)
    batch = jnp.repeat(jnp.arange(batch_size, dtype=jnp.int32), n)
    x = ptcloud_x.reshape(-1, hand_feats.shape[2])
    return x, pos, batch


# ====================== CREN forward ======================

@functools.partial(jax.jit, static_argnames=("normalize_pts", "test"))
def cren_forward(hand_verts, hand_feats, obj_verts, obj_feats, params, rot_key,
                 normalize_pts=True, test=False):
    batch_size, vh, _ = hand_verts.shape
    vo = obj_verts.shape[1]
    out = {}

    if normalize_pts:
        tform = get_normalizing_tform(hand_verts, obj_verts, rot_key)
        hand_verts = apply_tform(tform, hand_verts)
        obj_verts = apply_tform(tform, obj_verts)

    x, pos, batch = verts_to_pointcloud(hand_verts, hand_feats, obj_verts, obj_feats)
    del batch  # segment ids are implicit in the per-point MLP stand-in

    # feats and pos stay separate; the (N, 28) concat is done inside the kernel
    # as two dots into one accumulator.
    output_net, weight = pointnet_forward(x, pos, params["pointnet"])

    contact = output_net.reshape(batch_size, vh + vo, N_BINS)
    contact_weight = weight.reshape(batch_size, vh + vo, N_BINS)

    out["contact_hand"] = contact[:, :vh, :]
    out["contact_obj"] = contact[:, vh:, :]
    if not test:
        out["dis_feat_hand"] = disnet_forward(out["contact_hand"], params["hand_dis"])
        out["dis_feat_obj"] = disnet_forward(out["contact_obj"], params["obj_dis"])
    out["contact_hand_weight"] = contact_weight[:, :vh, :]
    out["contact_obj_weight"] = contact_weight[:, vh:, :]
    return out


# ====================== deterministic parameter init ======================

def init_params(key):
    def dense(k, din, dout, scale=0.1):
        kw, kb = jax.random.split(k)
        return (scale * jax.random.normal(kw, (din, dout), F32),
                scale * jax.random.normal(kb, (1, dout), F32))

    keys = jax.random.split(key, 8)
    w1, b1 = dense(keys[0], NET_IN, HIDDEN)
    w2, b2 = dense(keys[1], HIDDEN, HIDDEN)
    w3, b3 = dense(keys[2], HIDDEN, N_BINS)
    w4, b4 = dense(keys[3], HIDDEN, N_BINS)
    hw1, hb1 = dense(keys[4], N_BINS, DIS_HIDDEN)
    hw2, hb2 = dense(keys[5], DIS_HIDDEN, DIS_OUT)
    ow1, ob1 = dense(keys[6], N_BINS, DIS_HIDDEN)
    ow2, ob2 = dense(keys[7], DIS_HIDDEN, DIS_OUT)
    return {
        "pointnet": {"w1": w1, "b1": b1, "w2": w2, "b2": b2,
                     "w3": w3, "b3": b3, "w4": w4, "b4": b4},
        "hand_dis": {"w1": hw1, "b1": hb1, "w2": hw2, "b2": hb2},
        "obj_dis": {"w1": ow1, "b1": ob1, "w2": ow2, "b2": ob2},
    }


# ====================== main ======================

if __name__ == "__main__":
    key = jax.random.PRNGKey(0)
    k_hv, k_hf, k_ov, k_of, k_param, k_rot = jax.random.split(key, 6)

    B, VH, VO = 2, 8, 16   # (real model: VH=778, VO=2048 — handled via padded cdiv grid)
    hand_verts = jax.random.normal(k_hv, (B, VH, 3), F32)
    hand_feats = jax.random.normal(k_hf, (B, VH, FEAT_DIM), F32)
    obj_verts = jax.random.normal(k_ov, (B, VO, 3), F32)
    obj_feats = jax.random.normal(k_of, (B, VO, FEAT_DIM), F32)

    params = init_params(k_param)

    out = cren_forward(hand_verts, hand_feats, obj_verts, obj_feats, params, k_rot,
                       normalize_pts=True, test=False)
    out = jax.block_until_ready(out)

    assert out["contact_hand"].shape == (B, VH, N_BINS)
    assert out["contact_obj"].shape == (B, VO, N_BINS)
    assert out["contact_hand_weight"].shape == (B, VH, N_BINS)
    assert out["contact_obj_weight"].shape == (B, VO, N_BINS)
    assert out["dis_feat_hand"].shape == (B, DIS_OUT)
    assert out["dis_feat_obj"].shape == (B, DIS_OUT)
    assert bool(jnp.all(jnp.isfinite(out["contact_hand"])))
    assert bool(jnp.all((out["contact_obj_weight"] >= 0) & (out["contact_obj_weight"] <= 1)))
    print("KERNEL_OK")
</pallas_src>

<mosaic_0001>
module attributes {stable_mosaic.version = 11 : i64} {
  func.func @_disnet_kernel(%arg0: i32, %arg1: memref<32x10xf32, #tpu.memory_space<vmem>>, %arg2: memref<10x32xbf16, #tpu.memory_space<vmem>>, %arg3: memref<1x32xf32, #tpu.memory_space<vmem>>, %arg4: memref<32x32xbf16, #tpu.memory_space<vmem>>, %arg5: memref<1x32xf32, #tpu.memory_space<vmem>>, %arg6: memref<2x32xf32, #tpu.memory_space<vmem>>) attributes {dimension_semantics = [#tpu.dimension_semantics<arbitrary>], iteration_bounds = array<i64: 1>, scalar_prefetch = 0 : i64, scratch_operands = 0 : i64, tpu.core_type = #tpu.core_type<tc>, window_params = [{pipeline_mode = #tpu.pipeline_mode<synchronous>, transform_indices = @transform_0, window_bounds = array<i64: 32, 10>}, {pipeline_mode = #tpu.pipeline_mode<synchronous>, transform_indices = @transform_1, window_bounds = array<i64: 10, 32>}, {pipeline_mode = #tpu.pipeline_mode<synchronous>, transform_indices = @transform_2, window_bounds = array<i64: 1, 32>}, {pipeline_mode = #tpu.pipeline_mode<synchronous>, transform_indices = @transform_3, window_bounds = array<i64: 32, 32>}, {pipeline_mode = #tpu.pipeline_mode<synchronous>, transform_indices = @transform_4, window_bounds = array<i64: 1, 32>}, {pipeline_mode = #tpu.pipeline_mode<synchronous>, transform_indices = @transform_5, window_bounds = array<i64: 2, 32>}]} {
    %c0 = arith.constant 0 : index
    %c0_0 = arith.constant 0 : index
    %0 = vector.load %arg1[%c0, %c0_0] : memref<32x10xf32, #tpu.memory_space<vmem>>, vector<32x10xf32>
    %1 = arith.truncf %0 : vector<32x10xf32> to vector<32x10xbf16>
    %c0_1 = arith.constant 0 : index
    %c0_2 = arith.constant 0 : index
    %2 = vector.load %arg2[%c0_1, %c0_2] : memref<10x32xbf16, #tpu.memory_space<vmem>>, vector<10x32xbf16>
    %cst = arith.constant dense<0.000000e+00> : vector<32x32xf32>
    %3 = tpu.matmul %1, %2, %cst {dimension_numbers = #tpu.dot_dimension_numbers<[1], [0], [0], [1], [0, 0, 1, 1], [], []>} : vector<32x10xbf16>, vector<10x32xbf16>, vector<32x32xf32> -> vector<32x32xf32>
    %c0_3 = arith.constant 0 : index
    %c0_4 = arith.constant 0 : index
    %4 = vector.load %arg3[%c0_3, %c0_4] : memref<1x32xf32, #tpu.memory_space<vmem>>, vector<1x32xf32>
    %5 = vector.broadcast %4 : vector<1x32xf32> to vector<32x32xf32>
    %6 = arith.addf %3, %5 : vector<32x32xf32>
    %cst_5 = arith.constant 0.000000e+00 : f32
    %7 = vector.broadcast %cst_5 : f32 to vector<32x32xf32>
    %8 = arith.maximumf %6, %7 : vector<32x32xf32>
    %9 = tpu.iota {dimensions = array<i32: 0>} : vector<2x32xi32>
    %10 = tpu.iota {dimensions = array<i32: 1>} : vector<2x32xi32>
    %c16_i32 = arith.constant 16 : i32
    %11 = vector.broadcast %c16_i32 : i32 to vector<2x32xi32>
    %12 = arith.muli %9, %11 : vector<2x32xi32>
    %13 = arith.cmpi sge, %10, %12 : vector<2x32xi32>
    %c1_i32 = arith.constant 1 : i32
    %14 = vector.broadcast %c1_i32 : i32 to vector<2x32xi32>
    %15 = arith.addi %9, %14 : vector<2x32xi32>
    %c16_i32_6 = arith.constant 16 : i32
    %16 = vector.broadcast %c16_i32_6 : i32 to vector<2x32xi32>
    %17 = arith.muli %15, %16 : vector<2x32xi32>
    %18 = arith.cmpi slt, %10, %17 : vector<2x32xi32>
    %19 = arith.andi %13, %18 : vector<2x32xi1>
    %cst_7 = arith.constant 6.250000e-02 : f32
    %cst_8 = arith.constant 0.000000e+00 : f32
    %20 = vector.broadcast %cst_7 : f32 to vector<2x32xf32>
    %21 = vector.broadcast %cst_8 : f32 to vector<2x32xf32>
    %22 = arith.select %19, %20, %21 : vector<2x32xi1>, vector<2x32xf32>
    %23 = arith.truncf %22 : vector<2x32xf32> to vector<2x32xbf16>
    %24 = arith.truncf %8 : vector<32x32xf32> to vector<32x32xbf16>
    %cst_9 = arith.constant dense<0.000000e+00> : vector<2x32xf32>
    %25 = tpu.matmul %23, %24, %cst_9 {dimension_numbers = #tpu.dot_dimension_numbers<[1], [0], [0], [1], [0, 0, 1, 1], [], []>} : vector<2x32xbf16>, vector<32x32xbf16>, vector<2x32xf32> -> vector<2x32xf32>
    %26 = arith.truncf %25 : vector<2x32xf32> to vector<2x32xbf16>
    %c0_10 = arith.constant 0 : index
    %c0_11 = arith.constant 0 : index
    %27 = vector.load %arg4[%c0_10, %c0_11] : memref<32x32xbf16, #tpu.memory_space<vmem>>, vector<32x32xbf16>
    %cst_12 = arith.constant dense<0.000000e+00> : vector<2x32xf32>
    %28 = tpu.matmul %26, %27, %cst_12 {dimension_numbers = #tpu.dot_dimension_numbers<[1], [0], [0], [1], [0, 0, 1, 1], [], []>} : vector<2x32xbf16>, vector<32x32xbf16>, vector<2x32xf32> -> vector<2x32xf32>
    %c0_13 = arith.constant 0 : index
    %c0_14 = arith.constant 0 : index
    %29 = vector.load %arg5[%c0_13, %c0_14] : memref<1x32xf32, #tpu.memory_space<vmem>>, vector<1x32xf32>
    %30 = vector.broadcast %29 : vector<1x32xf32> to vector<2x32xf32>
    %31 = arith.addf %28, %30 : vector<2x32xf32>
    %c0_15 = arith.constant 0 : index
    %c0_16 = arith.constant 0 : index
    %32 = vector.load %arg6[%c0_15, %c0_16] : memref<2x32xf32, #tpu.memory_space<vmem>>, vector<2x32xf32>
    tpu.vector_store %arg6[%c0_15, %c0_16], %31 {strides = array<i32>} : memref<2x32xf32, #tpu.memory_space<vmem>>, vector<2x32xf32>,
    return
  }
  func.func @transform_0(%arg0: i32) -> (i32, i32) {
    %c0_i32 = arith.constant 0 : i32
    %c0_i32_0 = arith.constant 0 : i32
    %c0_i32_1 = arith.constant 0 : i32
    return %c0_i32, %c0_i32_0 : i32, i32
  }
  func.func @transform_1(%arg0: i32) -> (i32, i32) {
    %c0_i32 = arith.constant 0 : i32
    %c0_i32_0 = arith.constant 0 : i32
    %c0_i32_1 = arith.constant 0 : i32
    return %c0_i32, %c0_i32_0 : i32, i32
  }
  func.func @transform_2(%arg0: i32) -> (i32, i32) {
    %c0_i32 = arith.constant 0 : i32
    %c0_i32_0 = arith.constant 0 : i32
    %c0_i32_1 = arith.constant 0 : i32
    return %c0_i32, %c0_i32_0 : i32, i32
  }
  func.func @transform_3(%arg0: i32) -> (i32, i32) {
    %c0_i32 = arith.constant 0 : i32
    %c0_i32_0 = arith.constant 0 : i32
    %c0_i32_1 = arith.constant 0 : i32
    return %c0_i32, %c0_i32_0 : i32, i32
  }
  func.func @transform_4(%arg0: i32) -> (i32, i32) {
    %c0_i32 = arith.constant 0 : i32
    %c0_i32_0 = arith.constant 0 : i32
    %c0_i32_1 = arith.constant 0 : i32
    return %c0_i32, %c0_i32_0 : i32, i32
  }
  func.func @transform_5(%arg0: i32) -> (i32, i32) {
    %c0_i32 = arith.constant 0 : i32
    %c0_i32_0 = arith.constant 0 : i32
    %c0_i32_1 = arith.constant 0 : i32
    return %c0_i32, %c0_i32_0 : i32, i32
  }
}

module attributes {stable_mosaic.version = 11 : i64} {
  func.func @_pointnet_kernel(%arg0: i32, %arg1: memref<16x25xf32, #tpu.memory_space<vmem>>, %arg2: memref<16x3xf32, #tpu.memory_space<vmem>>, %arg3: memref<25x32xbf16, #tpu.memory_space<vmem>>, %arg4: memref<3x32xbf16, #tpu.memory_space<vmem>>, %arg5: memref<1x32xf32, #tpu.memory_space<vmem>>, %arg6: memref<32x32xbf16, #tpu.memory_space<vmem>>, %arg7: memref<1x32xf32, #tpu.memory_space<vmem>>, %arg8: memref<32x20xbf16, #tpu.memory_space<vmem>>, %arg9: memref<1x20xf32, #tpu.memory_space<vmem>>, %arg10: memref<16x20xf32, #tpu.memory_space<vmem>>) attributes {dimension_semantics = [#tpu.dimension_semantics<parallel>], iteration_bounds = array<i64: 3>, scalar_prefetch = 0 : i64, scratch_operands = 0 : i64, tpu.core_type = #tpu.core_type<tc>, window_params = [{transform_indices = @transform_0, window_bounds = array<i64: 16, 25>}, {transform_indices = @transform_1, window_bounds = array<i64: 16, 3>}, {pipeline_mode = #tpu.pipeline_mode<synchronous>, transform_indices = @transform_2, window_bounds = array<i64: 25, 32>}, {pipeline_mode = #tpu.pipeline_mode<synchronous>, transform_indices = @transform_3, window_bounds = array<i64: 3, 32>}, {pipeline_mode = #tpu.pipeline_mode<synchronous>, transform_indices = @transform_4, window_bounds = array<i64: 1, 32>}, {pipeline_mode = #tpu.pipeline_mode<synchronous>, transform_indices = @transform_5, window_bounds = array<i64: 32, 32>}, {pipeline_mode = #tpu.pipeline_mode<synchronous>, transform_indices = @transform_6, window_bounds = array<i64: 1, 32>}, {pipeline_mode = #tpu.pipeline_mode<synchronous>, transform_indices = @transform_7, window_bounds = array<i64: 32, 20>}, {pipeline_mode = #tpu.pipeline_mode<synchronous>, transform_indices = @transform_8, window_bounds = array<i64: 1, 20>}, {transform_indices = @transform_9, window_bounds = array<i64: 16, 20>}]} {
    %c0 = arith.constant 0 : index
    %c0_0 = arith.constant 0 : index
    %0 = vector.load %arg1[%c0, %c0_0] : memref<16x25xf32, #tpu.memory_space<vmem>>, vector<16x25xf32>
    %1 = arith.truncf %0 : vector<16x25xf32> to vector<16x25xbf16>
    %c0_1 = arith.constant 0 : index
    %c0_2 = arith.constant 0 : index
    %2 = vector.load %arg3[%c0_1, %c0_2] : memref<25x32xbf16, #tpu.memory_space<vmem>>, vector<25x32xbf16>
    %cst = arith.constant dense<0.000000e+00> : vector<16x32xf32>
    %3 = tpu.matmul %1, %2, %cst {dimension_numbers = #tpu.dot_dimension_numbers<[1], [0], [0], [1], [0, 0, 1, 1], [], []>} : vector<16x25xbf16>, vector<25x32xbf16>, vector<16x32xf32> -> vector<16x32xf32>
    %c0_3 = arith.constant 0 : index
    %c0_4 = arith.constant 0 : index
    %4 = vector.load %arg2[%c0_3, %c0_4] : memref<16x3xf32, #tpu.memory_space<vmem>>, vector<16x3xf32>
    %5 = arith.truncf %4 : vector<16x3xf32> to vector<16x3xbf16>
    %c0_5 = arith.constant 0 : index
    %c0_6 = arith.constant 0 : index
    %6 = vector.load %arg4[%c0_5, %c0_6] : memref<3x32xbf16, #tpu.memory_space<vmem>>, vector<3x32xbf16>
    %cst_7 = arith.constant dense<0.000000e+00> : vector<16x32xf32>
    %7 = tpu.matmul %5, %6, %cst_7 {dimension_numbers = #tpu.dot_dimension_numbers<[1], [0], [0], [1], [0, 0, 1, 1], [], []>} : vector<16x3xbf16>, vector<3x32xbf16>, vector<16x32xf32> -> vector<16x32xf32>
    %8 = arith.addf %3, %7 : vector<16x32xf32>
    %c0_8 = arith.constant 0 : index
    %c0_9 = arith.constant 0 : index
    %9 = vector.load %arg5[%c0_8, %c0_9] : memref<1x32xf32, #tpu.memory_space<vmem>>, vector<1x32xf32>
    %10 = vector.broadcast %9 : vector<1x32xf32> to vector<16x32xf32>
    %11 = arith.addf %8, %10 : vector<16x32xf32>
    %cst_10 = arith.constant 0.000000e+00 : f32
    %12 = vector.broadcast %cst_10 : f32 to vector<16x32xf32>
    %13 = arith.maximumf %11, %12 : vector<16x32xf32>
    %14 = arith.truncf %13 : vector<16x32xf32> to vector<16x32xbf16>
    %c0_11 = arith.constant 0 : index
    %c0_12 = arith.constant 0 : index
    %15 = vector.load %arg6[%c0_11, %c0_12] : memref<32x32xbf16, #tpu.memory_space<vmem>>, vector<32x32xbf16>
    %cst_13 = arith.constant dense<0.000000e+00> : vector<16x32xf32>
    %16 = tpu.matmul %14, %15, %cst_13 {dimension_numbers = #tpu.dot_dimension_numbers<[1], [0], [0], [1], [0, 0, 1, 1], [], []>} : vector<16x32xbf16>, vector<32x32xbf16>, vector<16x32xf32> -> vector<16x32xf32>
    %c0_14 = arith.constant 0 : index
    %c0_15 = arith.constant 0 : index
    %17 = vector.load %arg7[%c0_14, %c0_15] : memref<1x32xf32, #tpu.memory_space<vmem>>, vector<1x32xf32>
    %18 = vector.broadcast %17 : vector<1x32xf32> to vector<16x32xf32>
    %19 = arith.addf %16, %18 : vector<16x32xf32>
    %cst_16 = arith.constant 0.000000e+00 : f32
    %20 = vector.broadcast %cst_16 : f32 to vector<16x32xf32>
    %21 = arith.maximumf %19, %20 : vector<16x32xf32>
    %22 = arith.truncf %21 : vector<16x32xf32> to vector<16x32xbf16>
    %c0_17 = arith.constant 0 : index
    %c0_18 = arith.constant 0 : index
    %23 = vector.load %arg8[%c0_17, %c0_18] : memref<32x20xbf16, #tpu.memory_space<vmem>>, vector<32x20xbf16>
    %cst_19 = arith.constant dense<0.000000e+00> : vector<16x20xf32>
    %24 = tpu.matmul %22, %23, %cst_19 {dimension_numbers = #tpu.dot_dimension_numbers<[1], [0], [0], [1], [0, 0, 1, 1], [], []>} : vector<16x32xbf16>, vector<32x20xbf16>, vector<16x20xf32> -> vector<16x20xf32>
    %c0_20 = arith.constant 0 : index
    %c0_21 = arith.constant 0 : index
    %25 = vector.load %arg9[%c0_20, %c0_21] : memref<1x20xf32, #tpu.memory_space<vmem>>, vector<1x20xf32>
    %26 = vector.broadcast %25 : vector<1x20xf32> to vector<16x20xf32>
    %27 = arith.addf %24, %26 : vector<16x20xf32>
    %28 = tpu.iota {dimensions = array<i32: 1>} : vector<16x20xi32>
    %c10_i32 = arith.constant 10 : i32
    %29 = vector.broadcast %c10_i32 : i32 to vector<16x20xi32>
    %30 = arith.cmpi slt, %28, %29 : vector<16x20xi32>
    %31 = arith.negf %27 : vector<16x20xf32>
    %32 = math.exp %31 : vector<16x20xf32>
    %cst_22 = arith.constant 1.000000e+00 : f32
    %33 = vector.broadcast %cst_22 : f32 to vector<16x20xf32>
    %34 = arith.addf %33, %32 : vector<16x20xf32>
    %35 = arith.divf %33, %34 : vector<16x20xf32>
    %36 = arith.select %30, %27, %35 : vector<16x20xi1>, vector<16x20xf32>
    %c0_23 = arith.constant 0 : index
    %c0_24 = arith.constant 0 : index
    %37 = vector.load %arg10[%c0_23, %c0_24] : memref<16x20xf32, #tpu.memory_space<vmem>>, vector<16x20xf32>
    tpu.vector_store %arg10[%c0_23, %c0_24], %36 {strides = array<i32>} : memref<16x20xf32, #tpu.memory_space<vmem>>, vector<16x20xf32>,
    return
  }
  func.func @transform_0(%arg0: i32) -> (i32, i32) {
    %c0_i32 = arith.constant 0 : i32
    %c0_i32_0 = arith.constant 0 : i32
    return %arg0, %c0_i32 : i32, i32
  }
  func.func @transform_1(%arg0: i32) -> (i32, i32) {
    %c0_i32 = arith.constant 0 : i32
    %c0_i32_0 = arith.constant 0 : i32
    return %arg0, %c0_i32 : i32, i32
  }
  func.func @transform_2(%arg0: i32) -> (i32, i32) {
    %c0_i32 = arith.constant 0 : i32
    %c0_i32_0 = arith.constant 0 : i32
    %c0_i32_1 = arith.constant 0 : i32
    return %c0_i32, %c0_i32_0 : i32, i32
  }
  func.func @transform_3(%arg0: i32) -> (i32, i32) {
    %c0_i32 = arith.constant 0 : i32
    %c0_i32_0 = arith.constant 0 : i32
    %c0_i32_1 = arith.constant 0 : i32
    return %c0_i32, %c0_i32_0 : i32, i32
  }
  func.func @transform_4(%arg0: i32) -> (i32, i32) {
    %c0_i32 = arith.constant 0 : i32
    %c0_i32_0 = arith.constant 0 : i32
    %c0_i32_1 = arith.constant 0 : i32
    return %c0_i32, %c0_i32_0 : i32, i32
  }
  func.func @transform_5(%arg0: i32) -> (i32, i32) {
    %c0_i32 = arith.constant 0 : i32
    %c0_i32_0 = arith.constant 0 : i32
    %c0_i32_1 = arith.constant 0 : i32
    return %c0_i32, %c0_i32_0 : i32, i32
  }
  func.func @transform_6(%arg0: i32) -> (i32, i32) {
    %c0_i32 = arith.constant 0 : i32
    %c0_i32_0 = arith.constant 0 : i32
    %c0_i32_1 = arith.constant 0 : i32
    return %c0_i32, %c0_i32_0 : i32, i32
  }
  func.func @transform_7(%arg0: i32) -> (i32, i32) {
    %c0_i32 = arith.constant 0 : i32
    %c0_i32_0 = arith.constant 0 : i32
    %c0_i32_1 = arith.constant 0 : i32
    return %c0_i32, %c0_i32_0 : i32, i32
  }
  func.func @transform_8(%arg0: i32) -> (i32, i32) {
    %c0_i32 = arith.constant 0 : i32
    %c0_i32_0 = arith.constant 0 : i32
    %c0_i32_1 = arith.constant 0 : i32
    return %c0_i32, %c0_i32_0 : i32, i32
  }
  func.func @transform_9(%arg0: i32) -> (i32, i32) {
    %c0_i32 = arith.constant 0 : i32
    %c0_i32_0 = arith.constant 0 : i32
    return %arg0, %c0_i32 : i32, i32
  }
}

module attributes {stable_mosaic.version = 11 : i64} {
  func.func @_disnet_kernel(%arg0: i32, %arg1: memref<16x10xf32, #tpu.memory_space<vmem>>, %arg2: memref<10x32xbf16, #tpu.memory_space<vmem>>, %arg3: memref<1x32xf32, #tpu.memory_space<vmem>>, %arg4: memref<32x32xbf16, #tpu.memory_space<vmem>>, %arg5: memref<1x32xf32, #tpu.memory_space<vmem>>, %arg6: memref<2x32xf32, #tpu.memory_space<vmem>>) attributes {dimension_semantics = [#tpu.dimension_semantics<arbitrary>], iteration_bounds = array<i64: 1>, scalar_prefetch = 0 : i64, scratch_operands = 0 : i64, tpu.core_type = #tpu.core_type<tc>, window_params = [{pipeline_mode = #tpu.pipeline_mode<synchronous>, transform_indices = @transform_0, window_bounds = array<i64: 16, 10>}, {pipeline_mode = #tpu.pipeline_mode<synchronous>, transform_indices = @transform_1, window_bounds = array<i64: 10, 32>}, {pipeline_mode = #tpu.pipeline_mode<synchronous>, transform_indices = @transform_2, window_bounds = array<i64: 1, 32>}, {pipeline_mode = #tpu.pipeline_mode<synchronous>, transform_indices = @transform_3, window_bounds = array<i64: 32, 32>}, {pipeline_mode = #tpu.pipeline_mode<synchronous>, transform_indices = @transform_4, window_bounds = array<i64: 1, 32>}, {pipeline_mode = #tpu.pipeline_mode<synchronous>, transform_indices = @transform_5, window_bounds = array<i64: 2, 32>}]} {
    %c0 = arith.constant 0 : index
    %c0_0 = arith.constant 0 : index
    %0 = vector.load %arg1[%c0, %c0_0] : memref<16x10xf32, #tpu.memory_space<vmem>>, vector<16x10xf32>
    %1 = arith.truncf %0 : vector<16x10xf32> to vector<16x10xbf16>
    %c0_1 = arith.constant 0 : index
    %c0_2 = arith.constant 0 : index
    %2 = vector.load %arg2[%c0_1, %c0_2] : memref<10x32xbf16, #tpu.memory_space<vmem>>, vector<10x32xbf16>
    %cst = arith.constant dense<0.000000e+00> : vector<16x32xf32>
    %3 = tpu.matmul %1, %2, %cst {dimension_numbers = #tpu.dot_dimension_numbers<[1], [0], [0], [1], [0, 0, 1, 1], [], []>} : vector<16x10xbf16>, vector<10x32xbf16>, vector<16x32xf32> -> vector<16x32xf32>
    %c0_3 = arith.constant 0 : index
    %c0_4 = arith.constant 0 : index
    %4 = vector.load %arg3[%c0_3, %c0_4] : memref<1x32xf32, #tpu.memory_space<vmem>>, vector<1x32xf32>
    %5 = vector.broadcast %4 : vector<1x32xf32> to vector<16x32xf32>
    %6 = arith.addf %3, %5 : vector<16x32xf32>
    %cst_5 = arith.constant 0.000000e+00 : f32
    %7 = vector.broadcast %cst_5 : f32 to vector<16x32xf32>
    %8 = arith.maximumf %6, %7 : vector<16x32xf32>
    %9 = tpu.iota {dimensions = array<i32: 0>} : vector<2x16xi32>
    %10 = tpu.iota {dimensions = array<i32: 1>} : vector<2x16xi32>
    %c8_i32 = arith.constant 8 : i32
    %11 = vector.broadcast %c8_i32 : i32 to vector<2x16xi32>
    %12 = arith.muli %9, %11 : vector<2x16xi32>
    %13 = arith.cmpi sge, %10, %12 : vector<2x16xi32>
    %c1_i32 = arith.constant 1 : i32
    %14 = vector.broadcast %c1_i32 : i32 to vector<2x16xi32>
    %15 = arith.addi %9, %14 : vector<2x16xi32>
    %c8_i32_6 = arith.constant 8 : i32
    %16 = vector.broadcast %c8_i32_6 : i32 to vector<2x16xi32>
    %17 = arith.muli %15, %16 : vector<2x16xi32>
    %18 = arith.cmpi slt, %10, %17 : vector<2x16xi32>
    %19 = arith.andi %13, %18 : vector<2x16xi1>
    %cst_7 = arith.constant 1.250000e-01 : f32
    %cst_8 = arith.constant 0.000000e+00 : f32
    %20 = vector.broadcast %cst_7 : f32 to vector<2x16xf32>
    %21 = vector.broadcast %cst_8 : f32 to vector<2x16xf32>
    %22 = arith.select %19, %20, %21 : vector<2x16xi1>, vector<2x16xf32>
    %23 = arith.truncf %22 : vector<2x16xf32> to vector<2x16xbf16>
    %24 = arith.truncf %8 : vector<16x32xf32> to vector<16x32xbf16>
    %cst_9 = arith.constant dense<0.000000e+00> : vector<2x32xf32>
    %25 = tpu.matmul %23, %24, %cst_9 {dimension_numbers = #tpu.dot_dimension_numbers<[1], [0], [0], [1], [0, 0, 1, 1], [], []>} : vector<2x16xbf16>, vector<16x32xbf16>, vector<2x32xf32> -> vector<2x32xf32>
    %26 = arith.truncf %25 : vector<2x32xf32> to vector<2x32xbf16>
    %c0_10 = arith.constant 0 : index
    %c0_11 = arith.constant 0 : index
    %27 = vector.load %arg4[%c0_10, %c0_11] : memref<32x32xbf16, #tpu.memory_space<vmem>>, vector<32x32xbf16>
    %cst_12 = arith.constant dense<0.000000e+00> : vector<2x32xf32>
    %28 = tpu.matmul %26, %27, %cst_12 {dimension_numbers = #tpu.dot_dimension_numbers<[1], [0], [0], [1], [0, 0, 1, 1], [], []>} : vector<2x32xbf16>, vector<32x32xbf16>, vector<2x32xf32> -> vector<2x32xf32>
    %c0_13 = arith.constant 0 : index
    %c0_14 = arith.constant 0 : index
    %29 = vector.load %arg5[%c0_13, %c0_14] : memref<1x32xf32, #tpu.memory_space<vmem>>, vector<1x32xf32>
    %30 = vector.broadcast %29 : vector<1x32xf32> to vector<2x32xf32>
    %31 = arith.addf %28, %30 : vector<2x32xf32>
    %c0_15 = arith.constant 0 : index
    %c0_16 = arith.constant 0 : index
    %32 = vector.load %arg6[%c0_15, %c0_16] : memref<2x32xf32, #tpu.memory_space<vmem>>, vector<2x32xf32>
    tpu.vector_store %arg6[%c0_15, %c0_16], %31 {strides = array<i32>} : memref<2x32xf32, #tpu.memory_space<vmem>>, vector<2x32xf32>,
    return
  }
  func.func @transform_0(%arg0: i32) -> (i32, i32) {
    %c0_i32 = arith.constant 0 : i32
    %c0_i32_0 = arith.constant 0 : i32
    %c0_i32_1 = arith.constant 0 : i32
    return %c0_i32, %c0_i32_0 : i32, i32
  }
  func.func @transform_1(%arg0: i32) -> (i32, i32) {
    %c0_i32 = arith.constant 0 : i32
    %c0_i32_0 = arith.constant 0 : i32
    %c0_i32_1 = arith.constant 0 : i32
    return %c0_i32, %c0_i32_0 : i32, i32
  }
  func.func @transform_2(%arg0: i32) -> (i32, i32) {
    %c0_i32 = arith.constant 0 : i32
    %c0_i32_0 = arith.constant 0 : i32
    %c0_i32_1 = arith.constant 0 : i32
    return %c0_i32, %c0_i32_0 : i32, i32
  }
  func.func @transform_3(%arg0: i32) -> (i32, i32) {
    %c0_i32 = arith.constant 0 : i32
    %c0_i32_0 = arith.constant 0 : i32
    %c0_i32_1 = arith.constant 0 : i32
    return %c0_i32, %c0_i32_0 : i32, i32
  }
  func.func @transform_4(%arg0: i32) -> (i32, i32) {
    %c0_i32 = arith.constant 0 : i32
    %c0_i32_0 = arith.constant 0 : i32
    %c0_i32_1 = arith.constant 0 : i32
    return %c0_i32, %c0_i32_0 : i32, i32
  }
  func.func @transform_5(%arg0: i32) -> (i32, i32) {
    %c0_i32 = arith.constant 0 : i32
    %c0_i32_0 = arith.constant 0 : i32
    %c0_i32_1 = arith.constant 0 : i32
    return %c0_i32, %c0_i32_0 : i32, i32
  }
}

</mosaic_0001>

<bundles_post_ra>
// kernel: custom-call.11
= control target key start
LH: loop header
LB: loop body
LE: loop exit
PB: predicated region body
PF: predicated region fallthrough
CT: control target
= control target key end

     0   :  { %5 = vsyncpa [#allocation6], 0  ;;  %s896_s0 = inlined_call_operand.vmem [shape: f32[2,4,4], index: 0, kind: input, shape index: {}]   ;;  %s897_s1 = inlined_call_operand.vmem [shape: f32[2,4,4], index: 1, kind: output, shape index: {0}]   ;;  %s898_s2 = inlined_call_operand.hbm [shape: s32[2,4], index: 2, kind: output, shape index: {1}]   ;;  %s899_s3 = inlined_call_operand.vmem [shape: s32[2,4], index: 3, kind: output, shape index: {2}]  }
   0x1   :  { %7 = vsyncpa [#allocation6 + $0x1], 0  ;;  %s715_s12 = smov 0   ;;  %s717_s13 = smov 0  }
   0x2   :  { %s719_s14 = smov 0   ;;  %s721_s15 = smov 0  }
   0x3 LB: > { %s736_s16 = sadd.s32 4294967295, %s687_s15   ;;  %s550_s17 = sadd.s32 4294967294, %s687_s15   ;;  %s687_s15 = sphi %s721_s15, %s907_s15   ;;  %s683_s14 = sphi %s719_s14, %s906_s14   ;;  %s679_s13 = sphi %s717_s13, %s905_s13   ;;  %s675_s12 = sphi %s715_s12, %s904_s12  }
   0x4   : > { %s740_s18 = sadd.s32 1, %s687_s15   ;;  %s17_s19 = sshrl.u32 %s687_s15, 3 }
   0x5   : > { %s18_s20 = sshrl.u32 %s740_s18, 3  ;;  %s22_s21 = sadd.s32 1, %s683_s14 }
   0x6   : > { %s19_s22 = ssub.s32 %s17_s19, %s18_s20  ;;  %p32_p0 = scmp.ne.s32.totalorder %s683_s14, %s679_s13 }
   0x7   : > { %p20_p1 = scmp.eq.s32.totalorder %s19_s22, 0  ;;  %p33_p2 = scmp.eq.s32.totalorder %s736_s16, 1 }
   0x8   : > { %p38_p3 = scmp.ne.s32.totalorder %s679_s13, %s675_s12  ;;  %p39_p4 = scmp.eq.s32.totalorder %s550_s17, 1 }
   0x9   : > { %s751_s23 = scalar_select %p20_p1, %s683_s14, %s22_s21  }
   0xa   : > { %p753_p5 = por %p33_p2, %p32_p0  ;;  %p757_p6 = por %p39_p4, %p38_p3 }
   0xb   : > { %p552_p7 = scmp.ge.s32.totalorder %s687_s15, 2 }
   0xc   : > { %s85_s26 = sand.u32 (!%p552_p7), 1, %s687_s15   ;;  %s554_s27 = sshll.u32 (!%p552_p7), %s687_s15, 2 }
   0xd   : > { %83 = sbr.rel (%p552_p7) target bundleno = 20 (0x14), region = 16  ;;  %s553_s28 = sshll.u32 (!%p552_p7), %s85_s26, 2 }
   0xe   : > { %s89_s4 = scalar_lea.vmem (!%p552_p7), %s896_s0, %s554_s27  ;;  %s87_s5 = scalar_lea.vmem (!%p552_p7), [#allocation1], %s553_s28 }
   0xf   : > { %v105_v0 = vld [vmem:[%s89_s4] sm:$0xf] (!%p552_p7) }
  0x10   : > { %106 = vst [vmem:[%s87_s5] sm:$0xf] (!%p552_p7), %v105_v0 }
  0x14 PF: > { %p555_p8 = scmp.ge.s32.totalorder %s687_s15, 1  ;;  %p122_p9 = scmp.lt.s32.totalorder %s687_s15, 3 }
  0x16   : > { %p123_p10 = pnand %p555_p8, %p122_p9 }
  0x18   : > { %126 = sbr.rel (%p123_p10) target bundleno = 451 (0x1c3), region = 50 }
  0x1f   : > { %s133_s6 = sand.u32 1, %s736_s16   ;;  %s144_s7 = sand.u32 1, %s679_s13   ;;  %v166_v1 = vlaneseq  ;;  %v693_v4 = vmov 0  }
  0x20   : > { %s773_s8 = sshll.u32 %s133_s6, 2  ;;  %s777_s9 = sshll.u32 %s144_s7, 1 }
  0x21   : > { %v780_v2 = vshrl.u32 %v166_v1, 7  ;;  %s135_s10 = scalar_lea.vmem [#allocation1], %s773_s8  ;;  %s161_s11 = sand.u32 7, %s736_s16  }
  0x22   : > { %v155_v3 = vld [vmem:[%s135_s10] sm:$0xf]  ;;  %s785_s17 = scalar_lea.vmem [#allocation4], %s161_s11  ;;  %s139_s19 = scalar_lea.vmem [#allocation3], %s773_s8 }
  0x23   : > { %156 = vst [vmem:[#allocation0] sm:$0xf] %v155_v3  ;;  %170 = vst [vmem:[#allocation9] sm:$0xff] %v780_v2  ;;  %s146_s20 = scalar_lea.vmem [#allocation5], %s777_s9  ;;  %s152_s21 = scalar_lea.vmem [#allocation8], %s777_s9 }
  0x24   : > { %165 = vst [vmem:[%s785_s17] sm:$0x1] %v693_v4  ;;  %s791_s22 = scalar_lea.vmem [#allocation7], %s161_s11  ;;  %s793_s26 = smov 0  }
  0x2a   : > { %v159_v5 = vld [vmem:[#allocation0] sm:$0xff] }
  0x2b   : > { %160 = vst [vmem:[#allocation2] sm:$0xff] %v159_v5 }
  0x2c LB: >> { %vm186_vm0 = vcmp.lt.s32.totalorder %v780_v2, 4  ;;  %v800_v8 = vstv %s691_s26  ;;  %s227_s27 = ssub.s32 128, %s691_s26  ;;  %v233_v38 = vand.u32 127, %v166_v1  ;;  %v236_v40 = vld [vmem:[%s785_s17] ss:$0 sm:$0xff]  ;;  %s239_s28 = scalar_lea.vmem [#allocation2], %s691_s26  ;;  %s691_s26 = sphi %s793_s26, %s176_s26  }
  0x2d   : >> { %vm185_vm1 = vcmp.ge.s32.totalorder %v780_v2, %v800_v8  ;;  %s245_s30 = scalar_lea.vmem [#allocation9], %s691_s26  ;;  %vm265_vm15 = vcmp.gt.s32.totalorder %v780_v2, %v800_v8  ;;  %s176_s26 = sadd.s32 1, %s691_s26  }
  0x2e   : >> { %vm187_vm3 = vmand %vm185_vm1, %vm186_vm0  ;;  %vm257_vm12 = vcmp.gt.s32.totalorder %v233_v38, %v800_v8  ;;  %vm234_vm13 = vcmp.eq.s32.totalorder %v233_v38, %v800_v8  ;;  %v247_v42 = vld [vmem:[%s245_s30] ss:$0 sm:$0xff]  ;;  %p173_p11 = scmp.ge.s32.totalorder %s176_s26, 4  }
  0x2f   : >> { %vm269_vm1 = vmand %vm265_vm15, %vm234_vm13  ;;  %s900_s6 = sshrl.u32 (%p173_p11), %s736_s16, 3  ;;  %s564_s10 = sshll.u32 (%p173_p11), %s736_s16, 2 }
  0x30   : > { %s565_s11 = sshll.u32 (%p173_p11), %s900_s6, 5 }
  0x32   : >> { %v181_v6 = vld [vmem:[#allocation2] sm:$0xff]  ;;  %v241_v41 = vld [vmem:[%s239_s28] ss:$0 sm:$0xff] }
  0x33   : >> { %v182_v7 = vand.u32 2147483647, %v181_v6 }
  0x35   : >> { %vm560_vm2 = vcmp.gt.f32.partialorder %v182_v7, -inf }
  0x36   : >> { %vm189_vm4 = vmand %vm187_vm3, %vm560_vm2 }
  0x37   : >> { %v190_v9 = vsel %vm189_vm4, %v780_v2, %v800_v8  ;;  %v191_v10 = vsel %vm189_vm4, %v182_v7, -inf }
  0x38   : >> { %v192_v11 = vrot.slane %v191_v10, 1  ;;  %v193_v12 = vrot.slane %v190_v9, 1 }
  0x3a   : >> { %vm194_vm5 = vcmp.ge.f32.partialorder %v192_v11, %v191_v10  ;;  %v197_v13 = vrot.slane %v192_v11, 1  ;;  %v198_v14 = vrot.slane %v193_v12, 1 }
  0x3b   : >> { %v195_v15 = vsel %vm194_vm5, %v192_v11, %v191_v10  ;;  %v196_v16 = vsel %vm194_vm5, %v193_v12, %v190_v9 }
  0x3c   : >> { %vm199_vm6 = vcmp.ge.f32.partialorder %v197_v13, %v195_v15  ;;  %v202_v17 = vrot.slane %v197_v13, 1  ;;  %v203_v18 = vrot.slane %v198_v14, 1 }
  0x3d   : >> { %v200_v19 = vsel %vm199_vm6, %v197_v13, %v195_v15  ;;  %v201_v20 = vsel %vm199_vm6, %v198_v14, %v196_v16 }
  0x3e   : >> { %vm204_vm7 = vcmp.ge.f32.partialorder %v202_v17, %v200_v19  ;;  %v207_v21 = vrot.slane %v202_v17, 1  ;;  %v208_v22 = vrot.slane %v203_v18, 1 }
  0x3f   : >> { %v205_v23 = vsel %vm204_vm7, %v202_v17, %v200_v19  ;;  %v206_v24 = vsel %vm204_vm7, %v203_v18, %v201_v20 }
  0x40   : >> { %vm209_vm8 = vcmp.ge.f32.partialorder %v207_v21, %v205_v23  ;;  %v212_v25 = vrot.slane %v207_v21, 1  ;;  %v213_v26 = vrot.slane %v208_v22, 1 }
  0x41   : >> { %v210_v27 = vsel %vm209_vm8, %v207_v21, %v205_v23  ;;  %v211_v28 = vsel %vm209_vm8, %v208_v22, %v206_v24 }
  0x42   : >> { %vm214_vm9 = vcmp.ge.f32.partialorder %v212_v25, %v210_v27  ;;  %v217_v29 = vrot.slane %v212_v25, 1  ;;  %v218_v30 = vrot.slane %v213_v26, 1 }
  0x43   : >> { %v215_v31 = vsel %vm214_vm9, %v212_v25, %v210_v27  ;;  %v216_v32 = vsel %vm214_vm9, %v213_v26, %v211_v28 }
  0x44   : >> { %vm219_vm10 = vcmp.ge.f32.partialorder %v217_v29, %v215_v31  ;;  %v222_v33 = vrot.slane %v217_v29, 1  ;;  %v223_v34 = vrot.slane %v218_v30, 1 }
  0x45   : >> { %v220_v35 = vsel %vm219_vm10, %v217_v29, %v215_v31  ;;  %v221_v36 = vsel %vm219_vm10, %v218_v30, %v216_v32 }
  0x46   : >> { %vm224_vm11 = vcmp.ge.f32.partialorder %v222_v33, %v220_v35 }
  0x47   : >> { %v226_v37 = vsel %vm224_vm11, %v223_v34, %v221_v36 }
  0x48   : >> { %228 = vrot.lane.b32.xlu0 %v226_v37, %s227_s27  ;;  %s357_s27 = scalar_lea.vmem (%p173_p11), %s897_s1, %s564_s10 }
  0xba   : >> { %v229_v39 = vpop.permute.xlu0 %228 }
  0xbb   : >> { %569 = vpush %v229_v39 }
  0xec   : >> { %s570_s29 = spop %569 }
  0xed   : >> { %v235_v43 = vstv %s570_s29  ;;  %s240_s4 = scalar_lea.vmem [#allocation2], %s570_s29  ;;  %s246_s5 = scalar_lea.vmem [#allocation9], %s570_s29 }
  0xee   : >> { %v242_v44 = vld [vmem:[%s240_s4] ss:$0 sm:$0xff]  ;;  %v237_v46 = vsel %vm234_vm13, %v235_v43, %v236_v40 }
  0xef   : >> { %v248_v45 = vld [vmem:[%s246_s5] ss:$0 sm:$0xff]  ;;  %243 = vst [vmem:[%s240_s4] sm:$0x1] %v241_v41  ;;  %vm251_vm14 = vcmp.ne.f32.partialorder %v242_v44, 0.0  ;;  %238 = vst [vmem:[%s785_s17] sm:$0x1] %v237_v46  ;;  %v258_v53 = vsel %vm257_vm12, %v242_v44, 0.0 }
  0xf0   : >> { %249 = vst [vmem:[%s246_s5] sm:$0x1] %v247_v42  ;;  %244 = vst [vmem:[%s239_s28] sm:$0x1] %v242_v44  ;;  %s399_s4 = sshll.u32 (%p173_p11), %s146_s20, 4  ;;  %s348_s5 = scalar_lea.sflag (%p173_p11), [#allocation6], %s144_s7  ;;  %s400_s4 = int_to_ptr.vmem [resolvable:$true] %s399_s4 }
  0xf1   : >> { %250 = vst [vmem:[%s245_s30] sm:$0x1] %v248_v45  ;;  %vm252_vm0 = vmand %vm234_vm13, %vm251_vm14  ;;  %s843_s30 = scalar_lea.hbm (%p173_p11), %s898_s2, %s565_s11  ;;  %s621_s6 = scalar_lea.vmem (%p173_p11), %s400_s4, 32 }
  0xf2   : >> { %v253_v47 = vsel %vm252_vm0, %v242_v44, 1.0  ;;  %p622_p12 = scmp.ne.s32.totalorder (%p173_p11), %s400_s4, %s621_s6  ;;  %s694_s17 = smov (%p173_p11), [#allocation5]  }
  0xf3   : >> { %v266_v48 = vsel %vm265_vm15, %v253_v47, 1.0  ;;  %s625_s10 = sshll.u32 (%p173_p11), %s694_s17, 4  ;;  %s626_s10 = int_to_ptr.vmem [resolvable:$false] %s625_s10 }
  0xf4   : >> { %619 = vrcp.f32 %v266_v48  ;;  %p623_p13 = pnand (%p173_p11), %p622_p12, %p753_p5  ;;  %s627_s8 = scalar_lea.vmem (%p173_p11), %s626_s10, 64 }
  0xf5   : > { %p628_p1 = scmp.lt.s32.totalorder (%p173_p11), %s400_s4, %s626_s10  ;;  %p629_p2 = scmp.lt.s32.totalorder (%p173_p11), %s627_s8, %s621_s6 }
  0xf6   : > { %v334_v59 = vld [vmem:[#allocation4] sm:$0x3] (%p173_p11)  ;;  %p624_p0 = pneg (%p173_p11), %p623_p13 }
  0xf7   : >> { %v262_v50 = vld [vmem:[#allocation2] sm:$0xff]  ;;  %336 = vst [vmem:[%s146_s20] sm:$0x3] (%p173_p11), %v334_v59  ;;  %p630_p3 = por (%p173_p11), %p629_p2, %p628_p1 }
  0xf8   : > { %v276_v57 = vld [vmem:[#allocation9] sm:$0xff] (%p173_p11) }
  0xf9   : > { %p631_p4 = pnand (%p173_p11), %p630_p3, %p624_p0 }
  0xfe   : >> { %v620_v49 = vpop.eup %619 }
  0xff   : >> { %v268_v51 = vmul.f32 %v620_v49, %v262_v50 }
 0x101   : >> { %v270_v52 = vsel %vm269_vm1, %v268_v51, 0.0 }
 0x102   : >> { %271 = vadd.xlane.f32.xlu0 %v270_v52 }
 0x12f   : > { %292 = vxpose.xlu0.b32.start.end [1/1] (short) (narrow) (%p173_p11), %v276_v57, 8 }
 0x18e   : > { %175 = sbr.rel (!%p173_p11) target bundleno = 44 (0x2c), region = 202 }
 0x18f   : >> { %v272_v54 = vpop.xlane.xlu0 %271 }
 0x190   : >> { %v273_v55 = vmul.f32 %v272_v54, %v258_v53 }
 0x192   : >> { %v274_v56 = vsub.f32 %v268_v51, %v273_v55 }
 0x194   : >> { %275 = vst [vmem:[#allocation2] sm:$0xff] %v274_v56 }
 0x19b   : > { %v328_v58 = vld [vmem:[#allocation2] sm:$0xf] }
 0x19c   : > { %330 = vst [vmem:[%s139_s19] sm:$0xf] %v328_v58 }
 0x1a3   : > { %v373_v60 = vld [vmem:[%s139_s19] sm:$0xf] }
 0x1a4   : > { %374 = vst [vmem:[%s357_s27] sm:$0xf] %v373_v60 }
 0x1a5   : > { %634 = shalt.err (!%p631_p4)
}
 0x1a6   : > { %s635_s7 = scalar_lea.hbm %s843_s30, 32  ;;  %s639_s11 = scalar_lea.hbm %s898_s2, 32 }
 0x1a7   : > { %p636_p8 = scmp.ne.s32.totalorder %s843_s30, %s635_s7  ;;  %p640_p11 = scmp.lt.u32.totalorder %s843_s30, %s898_s2 }
 0x1a8   : > { %p641_p12 = scmp.lt.u32.totalorder %s639_s11, %s635_s7  ;;  %p643_p0 = scmp.lt.u32.totalorder %s635_s7, %s843_s30 }
 0x1a9   : > { %p637_p9 = pnand %p636_p8, %p753_p5 }
 0x1aa   : > { %p642_p13 = por %p641_p12, %p640_p11 }
 0x1ab   : > { %p638_p10 = pneg %p637_p9 }
 0x1ac   : > { %p644_p1 = por %p643_p0, %p642_p13 }
 0x1ae   : > { %p645_p2 = pnand %p644_p1, %p638_p10 }
 0x1b0   : > { %648 = shalt.err (!%p645_p2)
}
 0x1b1   : > { %571 = dma.vmem_to_hbm [thread:$0]  (%p753_p5), %s400_s4, 32, %s843_s30, %s348_s5   ;;  %v308_v61 = vpop.trf.xlu0 }
 0x1b2   : > { %324 = vst [vmem:[%s791_s22] sm:$0x1] %v308_v61  ;;  %s903_s6 = sshrl.u32 (%p753_p5), %s736_s16, 3 }
 0x1b3   : > { %s566_s28 = sshll.u32 (%p753_p5), %s903_s6, 1 }
 0x1b4   : > { %405 = sbr.rel (!%p753_p5) target bundleno = 451 (0x1c3), region = 96  ;;  %s408_s10 = scalar_lea.vmem (%p753_p5), %s899_s3, %s566_s28 }
 0x1b9   : > { %v340_v62 = vld [vmem:[#allocation7] sm:$0x3] }
 0x1ba   : > { %342 = vst [vmem:[%s152_s21] sm:$0x3] %v340_v62 }
 0x1c1   : > { %v424_v63 = vld [vmem:[%s152_s21] sm:$0x3] }
 0x1c2   : > { %425 = vst [vmem:[%s408_s10] sm:$0x3] %v424_v63 }
 0x1c3 PF: > { %s452_s22 = sand.u32 1, %s675_s12   ;;  %p574_p5 = pnand %p552_p7, %p757_p6 }
 0x1c4   : > { %s453_s24 = scalar_lea.sflag [#allocation6], %s452_s22 }
 0x1c5   : > { %670 = dma.done.wait (!%p574_p5), %s453_s24, 32  }
 0x1c6   : > { %672 = vsyncadd (!%p574_p5), %s453_s24, 4294967264  ;;  %p10_p3 = scmp.ge.s32.totalorder %s740_s18, 4   ;;  %s904_s12 = smov %s679_s13 }
 0x1c7   : > { %s905_s13 = smov %s683_s14  ;;  %s906_s14 = smov %s751_s23 }
 0x1c8   : > { %s907_s15 = smov %s740_s18  ;;  %12 = sbr.rel (!%p10_p3) target bundleno = 3 (0x3), region = 213 }
 0x1cf   :  { %465 = vsyncpa [#allocation6], 1 }
 0x1d0   :  { %467 = vsyncpa [#allocation6 + $0x1], 1 }

// kernel: custom-call.13
= control target key start
LH: loop header
LB: loop body
LE: loop exit
PB: predicated region body
PF: predicated region fallthrough
CT: control target
= control target key end

     0   :  { %s353_s6 = smov 0   ;;  %s355_s7 = smov 0   ;;  %s400_s0 = inlined_call_operand.vmem [shape: f32[2,1,4,4], index: 0, kind: input, shape index: {}]   ;;  %s401_s1 = inlined_call_operand.vmem [shape: f32[2,1,4,4], index: 1, kind: output, shape index: {}]  }
   0x1   :  { %s357_s8 = smov 0  }
   0x2 LB: > { %s279_s9 = sadd.s32 4294967295, %s340_s8   ;;  %s33_s10 = sadd.s32 1, %s336_s7  ;;  %s340_s8 = sphi %s357_s8, %s7_s8   ;;  %s336_s7 = sphi %s355_s7, %s403_s7   ;;  %s332_s6 = sphi %s353_s6, %s402_s6  }
   0x3   : > { %p35_p0 = scmp.ge.s32.totalorder %s33_s10, 2  ;;  %p281_p1 = scmp.ge.s32.totalorder %s340_s8, 2 }
   0x4   : > { %s49_s11 = sand.u32 (!%p281_p1), 1, %s340_s8   ;;  %s283_s12 = sshll.u32 (!%p281_p1), %s336_s7, 2 }
   0x5   : > { %s405_s10 = smov (%p35_p0, %s33_s10), 0  ;;  %47 = sbr.rel (%p281_p1) target bundleno = 12 (0xc), region = 16 }
   0x6   : > { %s282_s13 = sshll.u32 (!%p281_p1), %s49_s11, 2  ;;  %s56_s16 = scalar_lea.vmem (!%p281_p1), %s400_s0, %s283_s12 }
   0x7   : > { %v72_v0 = vld [vmem:[%s56_s16] sm:$0xf] (!%p281_p1)  ;;  %s51_s17 = scalar_lea.vmem (!%p281_p1), [#allocation1], %s282_s13 }
   0x8   : > { %73 = vst [vmem:[%s51_s17] sm:$0xf] (!%p281_p1), %v72_v0 }
   0xc PF: > { %p284_p2 = scmp.ge.s32.totalorder %s340_s8, 1  ;;  %p89_p3 = scmp.lt.s32.totalorder %s340_s8, 3 }
   0xe   : > { %p90_p4 = pnand %p284_p2, %p89_p3 }
  0x10   : > { %93 = sbr.rel (%p90_p4) target bundleno = 656 (0x290), region = 50 }
  0x17   : > { %s380_s18 = sand.u32 1, %s279_s9   ;;  %v111_v1 = vlaneseq  ;;  %v342_v11 = vmov -1.0   ;;  %s288_s22 = sshll.u32 %s332_s6, 2 }
  0x18   : > { %s285_s19 = sshll.u32 %s380_s18, 2  ;;  %s188_s25 = scalar_lea.vmem %s401_s1, %s288_s22 }
  0x19   : > { %s102_s20 = scalar_lea.vmem [#allocation1], %s285_s19  ;;  %v112_v3 = vand.u32 127, %v111_v1  ;;  %v115_v4 = vshrl.u32 %v111_v1, 7  ;;  %s106_s21 = scalar_lea.vmem [#allocation3], %s285_s19 }
  0x1a   : > { %v109_v2 = vld [vmem:[%s102_s20] sm:$0xf] }
  0x1b   : > { %110 = vst [vmem:[#allocation0] sm:$0xf] %v109_v2  ;;  %vm113_vm0 = vcmp.lt.s32.totalorder %v112_v3, 4  ;;  %vm122_vm1 = vcmp.ge.s32.totalorder %v115_v4, %v112_v3  ;;  %vm117_vm2 = vcmp.eq.s32.totalorder %v115_v4, %v112_v3  ;;  %vm136_vm4 = vcmp.eq.s32.totalorder %v112_v3, 0 }
  0x1c   : > { %vm123_vm3 = vmand %vm122_vm1, %vm113_vm0  ;;  %vm133_vm5 = vcmp.eq.s32.totalorder %v112_v3, %v115_v4  ;;  %v137_v12 = vsel %vm136_vm4, 1.0, %v342_v11  ;;  %vm144_vm6 = vcmp.eq.s32.totalorder %v112_v3, 1  ;;  %vm154_vm7 = vcmp.eq.s32.totalorder %v112_v3, 2 }
  0x1d   : > { %v138_v13 = vsel %vm133_vm5, %v137_v12, 0.0  ;;  %vm164_vm8 = vcmp.eq.s32.totalorder %v112_v3, 3 }
  0x22   : > { %v118_v5 = vld [vmem:[#allocation0] sm:$0xff] }
  0x23   : > { %v119_v6 = vsel %vm117_vm2, %v118_v5, 0.0  ;;  %v124_v7 = vsel %vm123_vm3, %v118_v5, 0.0 }
  0x24   : > { %120 = vadd.xlane.f32.xlu0 %v119_v6 }
  0xb1   : > { %v121_v8 = vpop.xlane.xlu0 %120 }
  0xb2   : > { %316 = vrcp.f32 %v121_v8  ;;  %vm171_vm9 = vweird.f32 %v121_v8 }
  0xbc   : > { %v317_v9 = vpop.eup %316 }
  0xbd   : > { %v126_v10 = vmul.f32 %v317_v9, %v124_v7 }
  0xbf   : > { %127 = vst [vmem:[#allocation4] sm:$0xff] %v126_v10 }
  0xc6   : > { %v140_v14 = vld [vmem:[#allocation4 + $0x1] ss:$0 sm:$0xff]  ;;  %v150_v17 = vld [vmem:[#allocation4 + $0x2] ss:$0 sm:$0xff]  ;;  %v160_v22 = vld [vmem:[#allocation4 + $0x3] ss:$0 sm:$0xff] }
  0xc7   : > { %v141_v15 = vxor.u32 2147483648, %v140_v14  ;;  %v151_v19 = vxor.u32 2147483648, %v150_v17  ;;  %v161_v24 = vxor.u32 2147483648, %v160_v22 }
  0xc9   : > { %v145_v16 = vmul.f32 %v141_v15, %v138_v13 }
  0xcb   : > { %146 = vadd.xlane.f32.xlu0 %v145_v16 }
 0x158   : > { %v147_v18 = vpop.xlane.xlu0 %146 }
 0x159   : > { %v148_v20 = vsel %vm144_vm6, %v147_v18, %v138_v13 }
 0x15a   : > { %v155_v21 = vmul.f32 %v151_v19, %v148_v20 }
 0x15c   : > { %156 = vadd.xlane.f32.xlu1 %v155_v21 }
 0x1e9   : > { %v157_v23 = vpop.xlane.xlu1 %156 }
 0x1ea   : > { %v158_v25 = vsel %vm154_vm7, %v157_v23, %v148_v20 }
 0x1eb   : > { %v165_v26 = vmul.f32 %v161_v24, %v158_v25 }
 0x1ed   : > { %166 = vadd.xlane.f32.xlu1 %v165_v26 }
 0x27a   : > { %v167_v27 = vpop.xlane.xlu1 %166 }
 0x27b   : > { %v168_v28 = vsel %vm164_vm8, %v167_v27, %v158_v25 }
 0x27c   : > { %v170_v29 = vmul.f32 %v317_v9, %v168_v28 }
 0x27e   : > { %v172_v30 = vsel %vm171_vm9, %v168_v28, %v170_v29 }
 0x27f   : > { %173 = vst [vmem:[#allocation2] sm:$0xff] %v172_v30 }
 0x286   : > { %v177_v31 = vld [vmem:[#allocation2] sm:$0xf] }
 0x287   : > { %179 = vst [vmem:[%s106_s21] sm:$0xf] %v177_v31 }
 0x28e   : > { %v204_v32 = vld [vmem:[%s106_s21] sm:$0xf] }
 0x28f   : > { %205 = vst [vmem:[%s188_s25] sm:$0xf] %v204_v32 }
 0x290 PF: > { %s7_s8 = sadd.s32 1, %s340_s8   ;;  %s402_s6 = smov %s336_s7 }
 0x291   : > { %p4_p5 = scmp.ge.s32.totalorder %s7_s8, 4   ;;  %s403_s7 = smov %s405_s10 }
 0x293   :  { %6 = sbr.rel (!%p4_p5) target bundleno = 2 (0x2), region = 113 }

// kernel: custom-call.12
= control target key start
LH: loop header
LB: loop body
LE: loop exit
PB: predicated region body
PF: predicated region fallthrough
CT: control target
= control target key end

     0   :  { %s352_s6 = smov 0   ;;  %s354_s7 = smov 0   ;;  %s399_s0 = inlined_call_operand.vmem [shape: f32[2,1,4,4], index: 0, kind: input, shape index: {}]   ;;  %s400_s1 = inlined_call_operand.vmem [shape: f32[2,1,4,4], index: 1, kind: output, shape index: {}]  }
   0x1   :  { %s356_s8 = smov 0  }
   0x2 LB: > { %s278_s9 = sadd.s32 4294967295, %s339_s8   ;;  %s33_s10 = sadd.s32 1, %s335_s7  ;;  %s339_s8 = sphi %s356_s8, %s7_s8   ;;  %s335_s7 = sphi %s354_s7, %s402_s7   ;;  %s331_s6 = sphi %s352_s6, %s401_s6  }
   0x3   : > { %p35_p0 = scmp.ge.s32.totalorder %s33_s10, 2  ;;  %p280_p1 = scmp.ge.s32.totalorder %s339_s8, 2 }
   0x4   : > { %s49_s11 = sand.u32 (!%p280_p1), 1, %s339_s8   ;;  %s282_s12 = sshll.u32 (!%p280_p1), %s335_s7, 2 }
   0x5   : > { %s404_s10 = smov (%p35_p0, %s33_s10), 0  ;;  %47 = sbr.rel (%p280_p1) target bundleno = 12 (0xc), region = 16 }
   0x6   : > { %s281_s13 = sshll.u32 (!%p280_p1), %s49_s11, 2  ;;  %s56_s16 = scalar_lea.vmem (!%p280_p1), %s399_s0, %s282_s12 }
   0x7   : > { %v72_v0 = vld [vmem:[%s56_s16] sm:$0xf] (!%p280_p1)  ;;  %s51_s17 = scalar_lea.vmem (!%p280_p1), [#allocation1], %s281_s13 }
   0x8   : > { %73 = vst [vmem:[%s51_s17] sm:$0xf] (!%p280_p1), %v72_v0 }
   0xc PF: > { %p283_p2 = scmp.ge.s32.totalorder %s339_s8, 1  ;;  %p89_p3 = scmp.lt.s32.totalorder %s339_s8, 3 }
   0xe   : > { %p90_p4 = pnand %p283_p2, %p89_p3 }
  0x10   : > { %93 = sbr.rel (%p90_p4) target bundleno = 656 (0x290), region = 50 }
  0x17   : > { %s379_s18 = sand.u32 1, %s278_s9   ;;  %v111_v1 = vlaneseq  ;;  %v341_v11 = vmov -1.0   ;;  %s287_s22 = sshll.u32 %s331_s6, 2 }
  0x18   : > { %s284_s19 = sshll.u32 %s379_s18, 2  ;;  %s187_s25 = scalar_lea.vmem %s400_s1, %s287_s22 }
  0x19   : > { %s102_s20 = scalar_lea.vmem [#allocation1], %s284_s19  ;;  %v112_v3 = vand.u32 127, %v111_v1  ;;  %v115_v4 = vshrl.u32 %v111_v1, 7  ;;  %s106_s21 = scalar_lea.vmem [#allocation3], %s284_s19 }
  0x1a   : > { %v109_v2 = vld [vmem:[%s102_s20] sm:$0xf] }
  0x1b   : > { %110 = vst [vmem:[#allocation0] sm:$0xf] %v109_v2  ;;  %vm113_vm0 = vcmp.lt.s32.totalorder %v112_v3, 4  ;;  %vm122_vm1 = vcmp.le.s32.totalorder %v115_v4, %v112_v3  ;;  %vm117_vm2 = vcmp.eq.s32.totalorder %v115_v4, %v112_v3  ;;  %vm136_vm4 = vcmp.eq.s32.totalorder %v112_v3, 3 }
  0x1c   : > { %vm123_vm3 = vmand %vm122_vm1, %vm113_vm0  ;;  %vm133_vm5 = vcmp.eq.s32.totalorder %v112_v3, %v115_v4  ;;  %v137_v12 = vsel %vm136_vm4, 1.0, %v341_v11  ;;  %vm144_vm6 = vcmp.eq.s32.totalorder %v112_v3, 2  ;;  %vm154_vm7 = vcmp.eq.s32.totalorder %v112_v3, 1 }
  0x1d   : > { %v138_v13 = vsel %vm133_vm5, %v137_v12, 0.0  ;;  %vm163_vm8 = vcmp.eq.s32.totalorder %v112_v3, 0 }
  0x22   : > { %v118_v5 = vld [vmem:[#allocation0] sm:$0xff] }
  0x23   : > { %v119_v6 = vsel %vm117_vm2, %v118_v5, 0.0  ;;  %v124_v7 = vsel %vm123_vm3, %v118_v5, 0.0 }
  0x24   : > { %120 = vadd.xlane.f32.xlu0 %v119_v6 }
  0xb1   : > { %v121_v8 = vpop.xlane.xlu0 %120 }
  0xb2   : > { %315 = vrcp.f32 %v121_v8  ;;  %vm170_vm9 = vweird.f32 %v121_v8 }
  0xbc   : > { %v316_v9 = vpop.eup %315 }
  0xbd   : > { %v126_v10 = vmul.f32 %v316_v9, %v124_v7 }
  0xbf   : > { %127 = vst [vmem:[#allocation4] sm:$0xff] %v126_v10 }
  0xc6   : > { %v140_v14 = vld [vmem:[#allocation4 + $0x2] ss:$0 sm:$0xff]  ;;  %v150_v17 = vld [vmem:[#allocation4 + $0x1] ss:$0 sm:$0xff]  ;;  %v159_v22 = vld [vmem:[#allocation4] ss:$0 sm:$0xff] }
  0xc7   : > { %v141_v15 = vxor.u32 2147483648, %v140_v14  ;;  %v151_v19 = vxor.u32 2147483648, %v150_v17  ;;  %v160_v24 = vxor.u32 2147483648, %v159_v22 }
  0xc9   : > { %v145_v16 = vmul.f32 %v141_v15, %v138_v13 }
  0xcb   : > { %146 = vadd.xlane.f32.xlu0 %v145_v16 }
 0x158   : > { %v147_v18 = vpop.xlane.xlu0 %146 }
 0x159   : > { %v148_v20 = vsel %vm144_vm6, %v147_v18, %v138_v13 }
 0x15a   : > { %v155_v21 = vmul.f32 %v151_v19, %v148_v20 }
 0x15c   : > { %156 = vadd.xlane.f32.xlu1 %v155_v21 }
 0x1e9   : > { %v157_v23 = vpop.xlane.xlu1 %156 }
 0x1ea   : > { %v158_v25 = vsel %vm154_vm7, %v157_v23, %v148_v20 }
 0x1eb   : > { %v164_v26 = vmul.f32 %v160_v24, %v158_v25 }
 0x1ed   : > { %165 = vadd.xlane.f32.xlu1 %v164_v26 }
 0x27a   : > { %v166_v27 = vpop.xlane.xlu1 %165 }
 0x27b   : > { %v167_v28 = vsel %vm163_vm8, %v166_v27, %v158_v25 }
 0x27c   : > { %v169_v29 = vmul.f32 %v316_v9, %v167_v28 }
 0x27e   : > { %v171_v30 = vsel %vm170_vm9, %v167_v28, %v169_v29 }
 0x27f   : > { %172 = vst [vmem:[#allocation2] sm:$0xff] %v171_v30 }
 0x286   : > { %v176_v31 = vld [vmem:[#allocation2] sm:$0xf] }
 0x287   : > { %178 = vst [vmem:[%s106_s21] sm:$0xf] %v176_v31 }
 0x28e   : > { %v203_v32 = vld [vmem:[%s106_s21] sm:$0xf] }
 0x28f   : > { %204 = vst [vmem:[%s187_s25] sm:$0xf] %v203_v32 }
 0x290 PF: > { %s7_s8 = sadd.s32 1, %s339_s8   ;;  %s401_s6 = smov %s335_s7 }
 0x291   : > { %p4_p5 = scmp.ge.s32.totalorder %s7_s8, 4   ;;  %s402_s7 = smov %s404_s10 }
 0x293   :  { %6 = sbr.rel (!%p4_p5) target bundleno = 2 (0x2), region = 112 }

// kernel: cren_forward.5
= control target key start
LH: loop header
LB: loop body
LE: loop exit
PB: predicated region body
PF: predicated region fallthrough
CT: control target
= control target key end

     0   :  { %vm49_vm0 = vcmask 1044480   ;;  %vm42_vm1 = vcmask 80896   ;;  %s390_s0 = inlined_call_operand.vmem [shape: f32[32,10], index: 0, kind: input, shape index: {}]   ;;  %s391_s1 = inlined_call_operand.vmem [shape: bf16[10,32], index: 1, kind: input, shape index: {}]   ;;  %s392_s2 = inlined_call_operand.vmem [shape: f32[1,32], index: 2, kind: input, shape index: {}]   ;;  %s393_s3 = inlined_call_operand.vmem [shape: bf16[32,32], index: 3, kind: input, shape index: {}]   ;;  %s394_s4 = inlined_call_operand.vmem [shape: f32[1,32], index: 4, kind: input, shape index: {}]   ;;  %s395_s5 = inlined_call_operand.hbm [shape: f32[2,32], index: 5, kind: output, shape index: {}]  }
   0x1   :  { %v291_v0 = vld [vmem:[%s391_s1] sm:$0x1f]   ;;  %v23_v2 = vld [vmem:[%s390_s0 + $0x8] sm:$0xff]  ;;  %v24_v3 = vld [vmem:[%s390_s0 + $0x10] sm:$0xff] }
   0x2   :  { %v22_v1 = vld [vmem:[%s390_s0] sm:$0xff]  ;;  %287 = vmatprep.subr.msk.bf16.mxu0 %vm49_vm0, %v291_v0  ;;  %v51_v4 = vsel %vm49_vm0, %v291_v0, 0  ;;  %v25_v6 = vld [vmem:[%s390_s0 + $0x18] sm:$0xff] }
   0x3   :  { %v26_v5 = vpack.c.bf16 %v23_v2, %v22_v1  ;;  %266 = vmatpush3.bf16.msra.mxu0 %v51_v4  ;;  %v27_v7 = vpack.c.bf16 %v25_v6, %v24_v3 }
   0x4   :  { %10 = vsyncpa [#allocation3], 0  ;;  %v318_v8 = vmov 0.0   ;;  %vm319_vm2 = vmmov 0   ;;  %v292_v9 = vld [vmem:[%s393_s3] sm:$0xff]   ;;  %v293_v10 = vld [vmem:[%s393_s3 + $0x8] sm:$0xff]   ;;  %v106_v11 = vlaneseq }
   0x5   :  { %267 = vmatprep.mubr.msk.bf16.mxu0 %vm42_vm1, %v26_v5  ;;  %271 = vmatprep.subr.bf16.mxu1 %v318_v8  ;;  %v247_v14 = vld [vmem:[%s392_s2] ss:$0 sm:$0xff]  ;;  %vm120_vm6 = vcmask 261120   ;;  %s320_s7 = smov [#allocation2]   ;;  %vm231_vm7 = vcmask 254976  }
   0x6   :  { %268 = vmatmul.mubr.msk.bf16.vlgmr.msra.gmra.mrb[0].mxu0 %vm42_vm1, %v27_v7  ;;  %279 = vmatprep.subr.bf16.mxu0 %v318_v8  ;;  %v107_v12 = vshrl.u32 %v106_v11, 7  ;;  %v109_v16 = vand.u32 127, %v106_v11  ;;  %v252_v39 = vld [vmem:[%s394_s4] ss:$0 sm:$0xff]  ;;  %s239_s8 = sshll.u32 %s320_s7, 4  ;;  %s240_s8 = int_to_ptr.vmem [resolvable:$true] %s239_s8 }
   0x7   :  { %275 = vmatprep.mubr.msk.bf16.mxu1 %vm319_vm2, %v318_v8  ;;  %283 = vmatprep.mubr.msk.bf16.mxu0 %vm319_vm2, %v318_v8  ;;  %s294_s9 = scalar_lea.vmem %s240_s8, 32  ;;  %p299_p1 = scmp.lt.s32.totalorder %s240_s8, %s240_s8 }
   0x8   :  { %280 = vmatpush3.bf16.msra.mxu0 %v292_v9  ;;  %v112_v13 = vadd.s32 1, %v107_v12  ;;  %v110_v17 = vmul.u32 16, %v107_v12  ;;  %p295_p0 = scmp.ne.s32.totalorder %s240_s8, %s294_s9  ;;  %p300_p2 = scmp.lt.s32.totalorder %s294_s9, %s294_s9 }
   0x9   :  { %281 = vmatprep.subr.bf16.mxu0 %v318_v8 }
   0xa   :  { %v113_v18 = vmul.u32 16, %v112_v13  ;;  %vm111_vm3 = vcmp.ge.s32.totalorder %v109_v16, %v110_v17  ;;  %p301_p3 = por %p300_p2, %p299_p1 }
   0xc   :  { %282 = vmatpush3.bf16.msra.mxu0 %v293_v10  ;;  %vm114_vm4 = vcmp.lt.s32.totalorder %v109_v16, %v113_v18  ;;  %p302_p4 = pnand %p301_p3, %p295_p0 }
   0xd   :  { %vm115_vm5 = vmand %vm111_vm3, %vm114_vm4 }
   0xe   :  { %v116_v32 = vsel %vm115_vm5, 0.0625, %v318_v8 }
   0xf   :  { %v117_v33 = vpack.c.bf16 %v116_v32, %v116_v32 }
  0xd9   :  { %v269_v15 = vpop.f32.mrb[0].mxu0 }
  0xda   :  { %v96_v19 = vadd.f32 %v269_v15, %v247_v14  ;;  %v87_v20 = vpop.f32.mrb[1].mxu0 }
  0xdb   :  { %v88_v21 = vadd.f32 %v247_v14, %v87_v20  ;;  %v270_v22 = vpop.f32.mrb[2].mxu0 }
  0xdc   :  { %v99_v23 = vadd.f32 %v270_v22, %v247_v14  ;;  %v90_v24 = vpop.f32.mrb[3].mxu0  ;;  %v104_v26 = vmax.f32 %v96_v19, 0.0 }
  0xdd   :  { %v91_v25 = vadd.f32 %v247_v14, %v90_v24  ;;  %v102_v28 = vmax.f32 %v88_v21, 0.0 }
  0xde   :  { %v105_v27 = vmax.f32 %v99_v23, 0.0 }
  0xdf   :  { %v103_v29 = vmax.f32 %v91_v25, 0.0 }
  0xe0   :  { %v119_v30 = vpack.c.bf16 %v105_v27, %v104_v26 }
  0xe1   :  { %v118_v31 = vpack.c.bf16 %v103_v29, %v102_v28 }
  0xe3   :  { %272 = vmatpush3.bf16.msra.mxu1 %v118_v31 }
  0xe4   :  { %273 = vmatprep.subr.bf16.mxu1 %v318_v8 }
  0xe7   :  { %274 = vmatpush3.bf16.msra.mxu1 %v119_v30 }
  0xea   :  { %276 = vmatmul.mubr.msk.bf16.vlgmr.msra.gmra.mrb[0].mxu1 %vm120_vm6, %v117_v33 }
 0x1bd   :  { %v158_v34 = vpop.f32.mrb[0].mxu1 }
 0x1be   :  { %v164_v35 = vpack.c.bf16 %v158_v34, %v158_v34  ;;  %v277_v36 = vpop.f32.mrb[1].mxu1 }
 0x1bf   :  { %v161_v37 = vpop.f32.mrb[2].mxu1 }
 0x1c0   :  { %v278_v38 = vpop.f32.mrb[3].mxu1  ;;  %284 = vmatmul.mubr.msk.bf16.vlgmr.msra.gmra.mrb[4].mxu0 %vm120_vm6, %v164_v35 }
 0x293   :  { %v225_v40 = vpop.f32.mrb[4].mxu0 }
 0x294   :  { %v226_v41 = vadd.f32 %v252_v39, %v225_v40  ;;  %v285_v42 = vpop.f32.mrb[5].mxu0 }
 0x295   :  { %v228_v43 = vpop.f32.mrb[6].mxu0 }
 0x296   :  { %v286_v44 = vpop.f32.mrb[7].mxu0  ;;  %232 = vst.msk [vmem:[#allocation2] sm:$0x3] %vm231_vm7, %v226_v41 }
 0x297   :  { %305 = shalt.err (!%p302_p4)
}
 0x298   :  { %s306_s4 = scalar_lea.hbm %s395_s5, 32 }
 0x299   :  { %p307_p5 = scmp.ne.s32.totalorder %s395_s5, %s306_s4  ;;  %p310_p6 = scmp.lt.u32.totalorder %s306_s4, %s395_s5 }
 0x29b   :  { %p312_p7 = pnand %p310_p6, %p307_p5 }
 0x29d   :  { %315 = shalt.err (!%p312_p7)
}
 0x29e   :  { %242 = dma.vmem_to_hbm [thread:$0]  %s240_s8, 32, %s395_s5, [#allocation3]  }
 0x29f   :  { %316 = dma.done.wait [#allocation3], 32  }
 0x2a0   :  { %317 = vsyncadd [#allocation3], 4294967264 }
 0x2a1   :  { %246 = vsyncpa [#allocation3], 1 }

// kernel: cren_forward.4
= control target key start
LH: loop header
LB: loop body
LE: loop exit
PB: predicated region body
PF: predicated region fallthrough
CT: control target
= control target key end

     0   :  { %vm43_vm0 = vcmask 1044480   ;;  %v296_v0 = vmov 0.0   ;;  %vm297_vm1 = vmmov 0   ;;  %vm39_vm2 = vcmask 80896   ;;  %s362_s0 = inlined_call_operand.vmem [shape: f32[16,10], index: 0, kind: input, shape index: {}]   ;;  %s363_s1 = inlined_call_operand.vmem [shape: bf16[10,32], index: 1, kind: input, shape index: {}]   ;;  %s364_s2 = inlined_call_operand.vmem [shape: f32[1,32], index: 2, kind: input, shape index: {}]   ;;  %s365_s3 = inlined_call_operand.vmem [shape: bf16[32,32], index: 3, kind: input, shape index: {}]   ;;  %s366_s4 = inlined_call_operand.vmem [shape: f32[1,32], index: 4, kind: input, shape index: {}]   ;;  %s367_s5 = inlined_call_operand.hbm [shape: f32[2,32], index: 5, kind: output, shape index: {}]  }
   0x1   :  { %246 = vmatprep.subr.bf16.mxu0 %v296_v0  ;;  %v269_v1 = vld [vmem:[%s363_s1] sm:$0x1f]   ;;  %v23_v3 = vld [vmem:[%s362_s0 + $0x8] sm:$0xff]  ;;  %252 = vmatprep.subr.bf16.mxu1 %v296_v0 }
   0x2   :  { %v22_v2 = vld [vmem:[%s362_s0] sm:$0xff]  ;;  %248 = vmatprep.mubr.msk.bf16.mxu0 %vm297_vm1, %v296_v0  ;;  %254 = vmatprep.mubr.msk.bf16.mxu1 %vm297_vm1, %v296_v0  ;;  %v45_v4 = vsel %vm43_vm0, %v269_v1, 0 }
   0x3   :  { %v24_v5 = vpack.c.bf16 %v23_v3, %v22_v2  ;;  %247 = vmatpush3.bf16.msra.mxu0 %v45_v4 }
   0x4   :  { %10 = vsyncpa [#allocation3], 0  ;;  %258 = vmatprep.subr.bf16.mxu0 %v296_v0  ;;  %v270_v6 = vld [vmem:[%s365_s3] sm:$0xff]   ;;  %v271_v7 = vld [vmem:[%s365_s3 + $0x8] sm:$0xff]   ;;  %v90_v8 = vlaneseq  ;;  %vm103_vm6 = vcmask 130048   ;;  %vm171_vm7 = vcmask 261120  }
   0x5   :  { %v231_v14 = vld [vmem:[%s364_s2] ss:$0 sm:$0xff]  ;;  %s298_s28 = smov [#allocation2]   ;;  %vm215_vm8 = vcmask 254976  }
   0x6   :  { %249 = vmatmul.mubr.msk.bf16.vlgmr.msra.gmra.mrb[0].mxu0 %vm39_vm2, %v24_v5  ;;  %v91_v9 = vshrl.u32 %v90_v8, 7  ;;  %v93_v11 = vand.u32 127, %v90_v8  ;;  %v235_v31 = vld [vmem:[%s366_s4] ss:$0 sm:$0xff]  ;;  %s223_s29 = sshll.u32 %s298_s28, 4  ;;  %s224_s29 = int_to_ptr.vmem [resolvable:$true] %s223_s29 }
   0x7   :  { %262 = vmatprep.mubr.msk.bf16.mxu0 %vm297_vm1, %v296_v0  ;;  %259 = vmatpush3.bf16.msra.mxu0 %v270_v6  ;;  %s272_s30 = scalar_lea.vmem %s224_s29, 32  ;;  %p277_p1 = scmp.lt.s32.totalorder %s224_s29, %s224_s29 }
   0x8   :  { %260 = vmatprep.subr.bf16.mxu0 %v296_v0  ;;  %v96_v10 = vadd.s32 1, %v91_v9  ;;  %v94_v12 = vmul.u32 8, %v91_v9  ;;  %p273_p0 = scmp.ne.s32.totalorder %s224_s29, %s272_s30  ;;  %p278_p2 = scmp.lt.s32.totalorder %s272_s30, %s272_s30 }
   0xa   :  { %v97_v13 = vmul.u32 8, %v96_v10  ;;  %vm95_vm3 = vcmp.ge.s32.totalorder %v93_v11, %v94_v12  ;;  %p279_p3 = por %p278_p2, %p277_p1 }
   0xb   :  { %261 = vmatpush3.bf16.msra.mxu0 %v271_v7 }
   0xc   :  { %vm98_vm4 = vcmp.lt.s32.totalorder %v93_v11, %v97_v13  ;;  %p280_p4 = pnand %p279_p3, %p273_p0 }
   0xd   :  { %vm99_vm5 = vmand %vm95_vm3, %vm98_vm4 }
   0xe   :  { %v100_v23 = vsel %vm99_vm5, 0.125, %v296_v0 }
   0xf   :  { %v101_v25 = vpack.c.bf16 %v100_v23, %v100_v23 }
  0xd9   :  { %v81_v15 = vpop.f32.mrb[0].mxu0 }
  0xda   :  { %v82_v16 = vadd.f32 %v231_v14, %v81_v15  ;;  %v250_v17 = vpop.f32.mrb[1].mxu0 }
  0xdb   :  { %v84_v18 = vpop.f32.mrb[2].mxu0 }
  0xdc   :  { %v85_v19 = vadd.f32 %v231_v14, %v84_v18  ;;  %v251_v20 = vpop.f32.mrb[3].mxu0  ;;  %v88_v21 = vmax.f32 %v82_v16, 0.0 }
  0xde   :  { %v89_v22 = vmax.f32 %v85_v19, 0.0 }
  0xe0   :  { %v102_v24 = vpack.c.bf16 %v89_v22, %v88_v21 }
  0xe2   :  { %253 = vmatpush3.bf16.msra.mxu1 %v102_v24 }
  0xe5   :  { %255 = vmatmul.mubr.msk.bf16.vlgmr.msra.gmra.mrb[0].mxu1 %vm103_vm6, %v101_v25 }
 0x1b8   :  { %v141_v26 = vpop.f32.mrb[0].mxu1 }
 0x1b9   :  { %v147_v27 = vpack.c.bf16 %v141_v26, %v141_v26  ;;  %v256_v28 = vpop.f32.mrb[1].mxu1 }
 0x1ba   :  { %v144_v29 = vpop.f32.mrb[2].mxu1 }
 0x1bb   :  { %v257_v30 = vpop.f32.mrb[3].mxu1  ;;  %263 = vmatmul.mubr.msk.bf16.vlgmr.msra.gmra.mrb[4].mxu0 %vm171_vm7, %v147_v27 }
 0x28e   :  { %v209_v32 = vpop.f32.mrb[4].mxu0 }
 0x28f   :  { %v210_v33 = vadd.f32 %v235_v31, %v209_v32  ;;  %v264_v34 = vpop.f32.mrb[5].mxu0 }
 0x290   :  { %v212_v35 = vpop.f32.mrb[6].mxu0 }
 0x291   :  { %v265_v36 = vpop.f32.mrb[7].mxu0  ;;  %216 = vst.msk [vmem:[#allocation2] sm:$0x3] %vm215_vm8, %v210_v33 }
 0x292   :  { %283 = shalt.err (!%p280_p4)
}
 0x293   :  { %s284_s4 = scalar_lea.hbm %s367_s5, 32 }
 0x294   :  { %p285_p5 = scmp.ne.s32.totalorder %s367_s5, %s284_s4  ;;  %p288_p6 = scmp.lt.u32.totalorder %s284_s4, %s367_s5 }
 0x296   :  { %p290_p7 = pnand %p288_p6, %p285_p5 }
 0x298   :  { %293 = shalt.err (!%p290_p7)
}
 0x299   :  { %226 = dma.vmem_to_hbm [thread:$0]  %s224_s29, 32, %s367_s5, [#allocation3]  }
 0x29a   :  { %294 = dma.done.wait [#allocation3], 32  }
 0x29b   :  { %295 = vsyncadd [#allocation3], 4294967264 }
 0x29c   :  { %230 = vsyncpa [#allocation3], 1 }

// kernel: cren_forward.3
= control target key start
LH: loop header
LB: loop body
LE: loop exit
PB: predicated region body
PF: predicated region fallthrough
CT: control target
= control target key end

     0   :  { %s878_s30 = smov 0   ;;  %s950_s0 = inlined_call_operand.vmem [shape: f32[48,25], index: 0, kind: input, shape index: {}]   ;;  %s951_s1 = inlined_call_operand.vmem [shape: f32[48,3], index: 1, kind: input, shape index: {}]   ;;  %s952_s2 = inlined_call_operand.vmem [shape: bf16[25,32], index: 2, kind: input, shape index: {}]   ;;  %s953_s3 = inlined_call_operand.vmem [shape: bf16[3,32], index: 3, kind: input, shape index: {}]   ;;  %s954_s4 = inlined_call_operand.vmem [shape: f32[1,32], index: 4, kind: input, shape index: {}]   ;;  %s955_s5 = inlined_call_operand.vmem [shape: bf16[32,32], index: 5, kind: input, shape index: {}]   ;;  %s956_s6 = inlined_call_operand.vmem [shape: f32[1,32], index: 6, kind: input, shape index: {}]   ;;  %s957_s7 = inlined_call_operand.vmem [shape: bf16[32,20], index: 7, kind: input, shape index: {}]   ;;  %s958_s8 = inlined_call_operand.vmem [shape: f32[1,20], index: 8, kind: input, shape index: {}]   ;;  %s959_s9 = inlined_call_operand.vmem [shape: f32[48,20], index: 9, kind: output, shape index: {}]  }
   0x1 LB: > { %s723_s10 = sadd.s32 4294967295, %s823_s30   ;;  %p727_p0 = scmp.ge.s32.totalorder %s823_s30, 1  ;;  %s823_s30 = sphi %s878_s30, %s19_s30  }
   0x2   : > { %p299_p1 = scmp.lt.s32.totalorder %s823_s30, 4 }
   0x4   : > { %p300_p2 = pnand %p727_p0, %p299_p1 }
   0x5   : > { %v803_v0 = vld [vmem:[%s952_s2] sm:$0xff] (!%p300_p2)   ;;  %v825_v1 = vmov (!%p300_p2), 0.0   ;;  %vm374_vm0 = vcmask (!%p300_p2), 1040384   ;;  %vm375_vm1 = vcmask (!%p300_p2), 1041408   ;;  %vm437_vm2 = vcmask (!%p300_p2), 1043456   ;;  %s728_s17 = sshll.u32 (!%p300_p2), %s723_s10, 1 }
   0x6   : > { %303 = sbr.rel (%p300_p2) target bundleno = 706 (0x2c2), region = 56  ;;  %768 = vmatprep.subr.bf16.mxu1 (!%p300_p2), %v825_v1  ;;  %762 = vmatprep.subr.bf16.mxu0 (!%p300_p2), %v825_v1  ;;  %v369_v2 = vld [vmem:[%s953_s3] sm:$0x3] (!%p300_p2)  ;;  %v826_v3 = vmov (!%p300_p2), 65535   ;;  %v804_v7 = vld [vmem:[%s952_s2 + $0x8] sm:$0x1f] (!%p300_p2)   ;;  %v635_v59 = vlaneseq (!%p300_p2) }
   0x7   : > { %769 = vmatpush3.bf16.msra.mxu1 (!%p300_p2), %v803_v0  ;;  %v376_v4 = vsel (!%p300_p2), %vm374_vm0, 4294967295, %v826_v3  ;;  %v439_v5 = vsel (!%p300_p2), %vm437_vm2, 4294967295, %v826_v3  ;;  %vm438_vm3 = vcmask (!%p300_p2), 1044480   ;;  %vm827_vm4 = vmmov (!%p300_p2), 0   ;;  %p341_p3 = scmp.lt.s32.totalorder (!%p300_p2), %s728_s17, 5  ;;  %v805_v17 = vld [vmem:[%s955_s5] sm:$0xff] (!%p300_p2)  }
   0x8   : > { %770 = vmatprep.subr.bf16.mxu1 (!%p300_p2), %v825_v1  ;;  %v377_v6 = vsel (!%p300_p2), %vm375_vm1, %v376_v4, 0  ;;  %v440_v9 = vsel (!%p300_p2), %vm438_vm3, %v439_v5, 0  ;;  %764 = vmatprep.mubr.msk.bf16.mxu0 (!%p300_p2), %vm827_vm4, %v825_v1  ;;  %vm370_vm5 = vcmask (!%p300_p2), 23552   ;;  %vm433_vm6 = vcmask (!%p300_p2), 203776   ;;  %v806_v18 = vld [vmem:[%s955_s5 + $0x8] sm:$0xff] (!%p300_p2)   ;;  %v807_v35 = vld [vmem:[%s957_s7] sm:$0xff] (!%p300_p2)  }
   0x9   : > { %v379_v8 = vand.u32 (!%p300_p2), %v377_v6, %v369_v2  ;;  %772 = vmatprep.mubr.msk.bf16.mxu1 (!%p300_p2), %vm827_vm4, %v825_v1  ;;  %v442_v10 = vand.u32 (!%p300_p2), %v804_v7, %v440_v9  ;;  %v738_v21 = vld [vmem:[%s954_s4] ss:$0 sm:$0xff] (!%p300_p2)  ;;  %vm520_vm7 = vcmask (!%p300_p2), 261120   ;;  %v808_v36 = vld [vmem:[%s957_s7 + $0x8] sm:$0xff] (!%p300_p2)   ;;  %v636_v61 = vand.u32 (!%p300_p2), 127, %v635_v59 }
   0xa   : > { %v739_v37 = vld [vmem:[%s956_s6] ss:$0 sm:$0xff] (!%p300_p2)  ;;  %vm652_vm9 = vcmask (!%p300_p2), 162816  }
   0xb   : > { %763 = vmatpush3.bf16.msra.mxu0 (!%p300_p2), %v379_v8  ;;  %771 = vmatpush3.bf16.msra.mxu1 (!%p300_p2), %v442_v10  ;;  %v743_v47 = vld [vmem:[%s958_s8] ss:$0 sm:$0xff] (!%p300_p2)  ;;  %vm637_vm8 = vcmp.lt.s32.totalorder (!%p300_p2), %v636_v61, 10 }
   0xc   : > { %776 = vmatprep.subr.bf16.mxu0 (!%p300_p2), %v825_v1  ;;  %784 = vmatprep.subr.bf16.mxu1 (!%p300_p2), %v825_v1 }
   0xd   : > { %s961_s17 = smov (!%p341_p3, %s728_s17), 5 }
   0xe   : > { %s903_s18 = sshll.u32 %s961_s17, 3 }
   0xf   : > { %s350_s21 = scalar_lea.vmem %s951_s1, %s903_s18  ;;  %s344_s24 = scalar_lea.vmem %s950_s0, %s903_s18 }
  0x10   : > { %v366_v11 = vld [vmem:[%s350_s21] sm:$0xff]  ;;  %v367_v12 = vld [vmem:[%s350_s21 + $0x8] sm:$0xff]  ;;  %s356_s22 = scalar_lea.vmem %s959_s9, %s903_s18 }
  0x11   : > { %v359_v13 = vld [vmem:[%s344_s24] sm:$0xff]  ;;  %v368_v14 = vpack.c.bf16 %v367_v12, %v366_v11  ;;  %v360_v15 = vld [vmem:[%s344_s24 + $0x8] sm:$0xff] }
  0x12   : > { %v361_v16 = vpack.c.bf16 %v360_v15, %v359_v13 }
  0x13   : > { %765 = vmatmul.mubr.msk.bf16.vlgmr.msra.gmra.mrb[0].mxu0 %vm370_vm5, %v368_v14 }
  0x14   : > { %773 = vmatmul.mubr.msk.bf16.vlgmr.msra.gmra.mrb[0].mxu1 %vm433_vm6, %v361_v16  ;;  %780 = vmatprep.mubr.msk.bf16.mxu0 %vm827_vm4, %v825_v1 }
  0x15   : > { %788 = vmatprep.mubr.msk.bf16.mxu1 %vm827_vm4, %v825_v1  ;;  %777 = vmatpush3.bf16.msra.mxu0 %v805_v17 }
  0x16   : > { %778 = vmatprep.subr.bf16.mxu0 %v825_v1  ;;  %785 = vmatpush3.bf16.msra.mxu1 %v807_v35 }
  0x17   : > { %786 = vmatprep.subr.bf16.mxu1 %v825_v1 }
  0x19   : > { %779 = vmatpush3.bf16.msra.mxu0 %v806_v18 }
  0x1a   : > { %787 = vmatpush3.bf16.msra.mxu1 %v808_v36 }
  0xe6   : > { %v415_v19 = vpop.f32.mrb[0].mxu0 }
  0xe7   : > { %v478_v20 = vpop.f32.mrb[0].mxu1  ;;  %v766_v22 = vpop.f32.mrb[1].mxu0 }
  0xe8   : > { %v479_v23 = vadd.f32 %v478_v20, %v415_v19  ;;  %v774_v24 = vpop.f32.mrb[1].mxu1  ;;  %v418_v25 = vpop.f32.mrb[2].mxu0 }
  0xe9   : > { %v481_v26 = vpop.f32.mrb[2].mxu1  ;;  %v767_v27 = vpop.f32.mrb[3].mxu0 }
  0xea   : > { %v492_v28 = vadd.f32 %v738_v21, %v479_v23  ;;  %v482_v29 = vadd.f32 %v481_v26, %v418_v25  ;;  %v775_v30 = vpop.f32.mrb[3].mxu1 }
  0xec   : > { %v493_v31 = vadd.f32 %v738_v21, %v482_v29  ;;  %v494_v32 = vmax.f32 %v492_v28, 0.0 }
  0xee   : > { %v495_v33 = vmax.f32 %v493_v31, 0.0 }
  0xf0   : > { %v496_v34 = vpack.c.bf16 %v495_v33, %v494_v32 }
  0xf2   : > { %781 = vmatmul.mubr.msk.bf16.vlgmr.msra.gmra.mrb[4].mxu0 %vm520_vm7, %v496_v34 }
 0x1c5   : > { %v558_v38 = vpop.f32.mrb[4].mxu0 }
 0x1c6   : > { %v559_v39 = vadd.f32 %v739_v37, %v558_v38  ;;  %v782_v40 = vpop.f32.mrb[5].mxu0 }
 0x1c7   : > { %v561_v41 = vpop.f32.mrb[6].mxu0 }
 0x1c8   : > { %v562_v42 = vadd.f32 %v739_v37, %v561_v41  ;;  %v783_v43 = vpop.f32.mrb[7].mxu0  ;;  %v565_v44 = vmax.f32 %v559_v39, 0.0 }
 0x1ca   : > { %v566_v45 = vmax.f32 %v562_v42, 0.0 }
 0x1cc   : > { %v567_v46 = vpack.c.bf16 %v566_v45, %v565_v44 }
 0x1ce   : > { %789 = vmatmul.mubr.msk.bf16.vlgmr.msra.gmra.mrb[4].mxu1 %vm520_vm7, %v567_v46 }
 0x2a1   : > { %v628_v48 = vpop.f32.mrb[4].mxu1 }
 0x2a2   : > { %v629_v49 = vadd.f32 %v743_v47, %v628_v48  ;;  %v790_v50 = vpop.f32.mrb[5].mxu1 }
 0x2a3   : > { %v631_v51 = vpop.f32.mrb[6].mxu1 }
 0x2a4   : > { %v747_v52 = vmul.f32 -1.442695, %v629_v49  ;;  %v632_v53 = vadd.f32 %v743_v47, %v631_v51  ;;  %v791_v54 = vpop.f32.mrb[7].mxu1 }
 0x2a6   : > { %809 = vpow2.f32 %v747_v52  ;;  %v748_v55 = vmul.f32 -1.442695, %v632_v53 }
 0x2a8   : > { %811 = vpow2.f32 %v748_v55 }
 0x2b0   : > { %v810_v56 = vpop.eup %809 }
 0x2b1   : > { %v644_v57 = vadd.f32 1.0, %v810_v56 }
 0x2b2   : > { %v812_v58 = vpop.eup %811 }
 0x2b3   : > { %813 = vrcp.f32 %v644_v57  ;;  %v645_v60 = vadd.f32 1.0, %v812_v58 }
 0x2b5   : > { %815 = vrcp.f32 %v645_v60 }
 0x2bd   : > { %v814_v62 = vpop.eup %813 }
 0x2be   : > { %v650_v63 = vsel %vm637_vm8, %v629_v49, %v814_v62 }
 0x2bf   : > { %v816_v0 = vpop.eup %815  ;;  %653 = vst.msk [vmem:[%s356_s22] sm:$0xff] %vm652_vm9, %v650_v63 }
 0x2c0   : > { %v651_v1 = vsel %vm637_vm8, %v632_v53, %v816_v0 }
 0x2c1   : > { %654 = vst.msk [vmem:[%s356_s22 + $0x8] sm:$0xff] %vm652_vm9, %v651_v1 }
 0x2c2 PF: > { %s19_s30 = sadd.s32 1, %s823_s30  }
 0x2c3   : > { %p16_p4 = scmp.ge.s32.totalorder %s19_s30, 5  }
 0x2c5   :  { %18 = sbr.rel (!%p16_p4) target bundleno = 1 (0x1), region = 89 }

</bundles_post_ra>
